<compile_context>
chip_gen: v7x
topology: tpu7x:2x2x1
jax: 0.10.0
libtpu: 0.0.40
codegen_flags: <defaults>
</compile_context>

<pallas_src>
import functools

import jax
import jax.numpy as jnp
import numpy as np
from jax.experimental import pallas as pl
from jax.experimental.pallas import tpu as pltpu


def _round_up(x, m):
    return (x + m - 1) // m * m


# ------------------------------ fused kernel -------------------------------

def _fused_lstm_kernel(x_ref, *args, num_layers, act_dtype, unroll):
    """All LSTM layers + final ReLU for one (batch-block, time-chunk) tile.

    x_ref            : (Tc, bb, IN)     compute-dtype input chunk (time-major)
    per layer l:
      args[3l + 0]   : (IN_l, 4*Hp)     W_ih^T, gate-padded, compute dtype
      args[3l + 1]   : (Hp,   4*Hp)     W_hh^T, gate-padded, compute dtype
      args[3l + 2]   : (1,    4*Hp)     b_ih + b_hh, f32
    args[3L]         : out_ref  (Tc, bb, Hp)     compute dtype
    args[3L + 1]     : gates_sc (Tc, bb, 4*Hp)   compute dtype (chunk gates)
    args[3L + 2]     : act_sc   (Tc, bb, Hp)     compute dtype (inter-layer)
    args[3L + 3]     : h_sc     (L, bb, Hp)      f32 (state, persists chunks)
    args[3L + 4]     : c_sc     (L, bb, Hp)      f32 (state, persists chunks)
    """
    out_ref = args[3 * num_layers]
    gates_sc = args[3 * num_layers + 1]
    act_sc = args[3 * num_layers + 2]
    h_sc = args[3 * num_layers + 3]
    c_sc = args[3 * num_layers + 4]

    Tc, bb, _ = x_ref.shape
    Hp = out_ref.shape[-1]

    # Fresh h/c state at the first time-chunk of every batch block.
    @pl.when(pl.program_id(1) == 0)
    def _():
        h_sc[...] = jnp.zeros_like(h_sc)
        c_sc[...] = jnp.zeros_like(c_sc)

    for layer in range(num_layers):
        wih_ref = args[3 * layer + 0]
        whh_ref = args[3 * layer + 1]
        b_ref = args[3 * layer + 2]
        is_last = layer == num_layers - 1
        cdt = whh_ref.dtype

        # ---- hoisted input projection for this chunk: one large MXU matmul.
        if layer == 0:
            xin = x_ref[...].reshape(Tc * bb, x_ref.shape[-1])
        else:
            xin = act_sc[...].reshape(Tc * bb, Hp)
        gates_x = jnp.dot(xin, wih_ref[...],
                          preferred_element_type=jnp.float32) + b_ref[...]
        gates_sc[...] = gates_x.reshape(Tc, bb, 4 * Hp).astype(gates_sc.dtype)

        # ---- sequential recurrence: only the (bb,Hp)x(Hp,4Hp) matmul left.
        def step(t, carry, whh_ref=whh_ref, is_last=is_last, cdt=cdt):
            h, c = carry                                   # f32 (bb, Hp)
            g = jnp.dot(h.astype(cdt), whh_ref[...],
                        preferred_element_type=jnp.float32)
            g = g + gates_sc[t].astype(jnp.float32)        # f32 (bb, 4Hp)
            ga = g.astype(act_dtype)                       # EUP in compute dtype
            i_g = jax.nn.sigmoid(ga[:, 0 * Hp:1 * Hp]).astype(jnp.float32)
            f_g = jax.nn.sigmoid(ga[:, 1 * Hp:2 * Hp]).astype(jnp.float32)
            g_g = jnp.tanh(ga[:, 2 * Hp:3 * Hp]).astype(jnp.float32)
            o_g = jax.nn.sigmoid(ga[:, 3 * Hp:4 * Hp]).astype(jnp.float32)
            c = f_g * c + i_g * g_g                        # state stays f32
            h = o_g * jnp.tanh(c.astype(act_dtype)).astype(jnp.float32)
            if is_last:
                out_ref[t] = jnp.maximum(h, 0.0).astype(out_ref.dtype)
            else:
                act_sc[t] = h.astype(act_sc.dtype)
            return (h, c)

        h_f, c_f = jax.lax.fori_loop(0, Tc, step, (h_sc[layer], c_sc[layer]),
                                     unroll=unroll)
        h_sc[layer] = h_f
        c_sc[layer] = c_f


# ------------------------------ host wrapper -------------------------------

def _pad_gates_axis(w, H, Hp):
    """Pad the trailing 4*H (i,f,g,o) gate axis to 4*Hp, per gate block."""
    if Hp == H:
        return w
    lead = w.shape[:-1]
    w4 = w.reshape(*lead, 4, H)
    w4 = jnp.pad(w4, [(0, 0)] * len(lead) + [(0, 0), (0, Hp - H)])
    return w4.reshape(*lead, 4 * Hp)


def encoder_rnn_forward(x, params, *, compute_dtype=jnp.bfloat16,
                        time_block=32, batch_block=None,
                        vmem_limit_bytes=None, interpret=False):
    """EncoderRNN.forward: relu(lstm(x)[0]).

    x: (batch, seq, input_size) float32 (batch_first, like the PyTorch module)
    params: per-layer dicts {w_ih_t: (IN,4H), w_hh_t: (H,4H), bias: (4H,)}
    batch_block: per-core batch tile; on v7x pass ~Bp//2 so the "parallel"
                 batch-block grid axis feeds both TensorCores.
    returns: (batch, seq, hidden_size) float32
    """
    B, S, IN = x.shape
    H = params[0]["w_hh_t"].shape[0]
    num_layers = len(params)

    sub = 8 if jnp.dtype(compute_dtype).itemsize == 4 else 16
    # For H >= 128 pad per-gate to a lane multiple; for small H only pad to
    # the sublane granule (avoids a 16x padded-MXU/VPU blow-up, e.g. H=32).
    Hp = _round_up(H, 128) if H >= 128 else _round_up(H, sub)
    Bp = _round_up(B, sub)
    bb = Bp if batch_block is None else _round_up(min(batch_block, Bp), sub)
    Bp = _round_up(Bp, bb)
    nb = Bp // bb                          # batch blocks -> "parallel" axis

    Tc = S if time_block is None else max(1, min(int(time_block), S))
    Sp = _round_up(S, Tc)
    nt = Sp // Tc                          # time chunks -> "arbitrary" axis

    # time-major, padded, compute-dtype input
    x_tm = jnp.transpose(x.astype(compute_dtype), (1, 0, 2))
    x_tm = jnp.pad(x_tm, ((0, Sp - S), (0, Bp - B), (0, 0)))

    flat_w = []
    in_specs = [pl.BlockSpec((Tc, bb, IN), lambda b, t: (t, b, 0))]
    for li, p in enumerate(params):
        in_rows = IN if li == 0 else Hp
        w_ih_t = _pad_gates_axis(p["w_ih_t"].astype(jnp.float32), H, Hp)
        if li > 0 and Hp > H:
            w_ih_t = jnp.pad(w_ih_t, ((0, Hp - H), (0, 0)))
        w_hh_t = _pad_gates_axis(p["w_hh_t"].astype(jnp.float32), H, Hp)
        if Hp > H:
            w_hh_t = jnp.pad(w_hh_t, ((0, Hp - H), (0, 0)))
        bias = _pad_gates_axis(p["bias"].astype(jnp.float32), H, Hp)
        flat_w += [w_ih_t.astype(compute_dtype),
                   w_hh_t.astype(compute_dtype),
                   bias.reshape(1, 4 * Hp)]              # bias stays f32
        # NOTE(v7x): these weight blocks are constant across the grid; with a
        # Pallas build that supports it, add pipeline_mode=pl.Buffered(1) to
        # drop their double-buffer and free VMEM for bigger bb/Tc.
        in_specs += [
            pl.BlockSpec((in_rows, 4 * Hp), lambda b, t: (0, 0)),
            pl.BlockSpec((Hp, 4 * Hp), lambda b, t: (0, 0)),
            pl.BlockSpec((1, 4 * Hp), lambda b, t: (0, 0)),
        ]

    kernel = functools.partial(_fused_lstm_kernel, num_layers=num_layers,
                               act_dtype=compute_dtype, unroll=min(Tc, 8))

    # Advisory cost estimate so XLA schedules surrounding ops sensibly.
    itemsize = jnp.dtype(compute_dtype).itemsize
    flops = 0
    bytes_accessed = B * S * IN * itemsize + B * S * H * itemsize
    for li in range(num_layers):
        in_l = IN if li == 0 else H
        flops += 2 * S * B * (in_l + H) * 4 * H
        bytes_accessed += (in_l + H) * 4 * H * itemsize + 4 * H * 4
    cost = pl.CostEstimate(flops=int(flops),
                           transcendentals=int(5 * S * B * H * num_layers),
                           bytes_accessed=int(bytes_accessed))

    out_tm = pl.pallas_call(
        kernel,
        out_shape=jax.ShapeDtypeStruct((Sp, Bp, Hp), compute_dtype),
        grid_spec=pltpu.PrefetchScalarGridSpec(
            num_scalar_prefetch=0,
            grid=(nb, nt),
            in_specs=in_specs,
            out_specs=pl.BlockSpec((Tc, bb, Hp), lambda b, t: (t, b, 0)),
            scratch_shapes=[
                pltpu.VMEM((Tc, bb, 4 * Hp), compute_dtype),    # chunk gates
                pltpu.VMEM((Tc, bb, Hp), compute_dtype),        # inter-layer
                pltpu.VMEM((num_layers, bb, Hp), jnp.float32),  # h state
                pltpu.VMEM((num_layers, bb, Hp), jnp.float32),  # c state
            ],
        ),
        compiler_params=pltpu.CompilerParams(
            dimension_semantics=("parallel", "arbitrary"),
            vmem_limit_bytes=vmem_limit_bytes,
        ),
        cost_estimate=cost,
        interpret=interpret,
    )(x_tm, *flat_w)

    # Residual host-side transpose now moves compute-dtype (bf16) bytes only.
    out = jnp.transpose(out_tm, (1, 0, 2))[:B, :S, :H]
    return out.astype(jnp.float32)


# ----------------------------- parameter init ------------------------------

def init_params(key, input_size, hidden_size, num_layers):
    """Synthetic init matching nn.LSTM parameter shapes.

    Layer 0 weights use xavier_uniform(gain=sqrt(2)) as in the module's
    __init__; other layers / biases use the default U(-1/sqrt(H), 1/sqrt(H)).
    Weights are stored pre-transposed: w_ih_t=(IN,4H), w_hh_t=(H,4H).
    """
    params = []
    k = 1.0 / np.sqrt(hidden_size)
    for layer in range(num_layers):
        in_sz = input_size if layer == 0 else hidden_size
        key, k1, k2, k3, k4 = jax.random.split(key, 5)
        if layer == 0:
            gain = np.sqrt(2.0)
            bound_ih = gain * np.sqrt(6.0 / (4 * hidden_size + in_sz))
            bound_hh = gain * np.sqrt(6.0 / (4 * hidden_size + hidden_size))
            w_ih = jax.random.uniform(k1, (4 * hidden_size, in_sz),
                                      jnp.float32, -bound_ih, bound_ih)
            w_hh = jax.random.uniform(k2, (4 * hidden_size, hidden_size),
                                      jnp.float32, -bound_hh, bound_hh)
        else:
            w_ih = jax.random.uniform(k1, (4 * hidden_size, in_sz),
                                      jnp.float32, -k, k)
            w_hh = jax.random.uniform(k2, (4 * hidden_size, hidden_size),
                                      jnp.float32, -k, k)
        b_ih = jax.random.uniform(k3, (4 * hidden_size,), jnp.float32, -k, k)
        b_hh = jax.random.uniform(k4, (4 * hidden_size,), jnp.float32, -k, k)
        params.append({
            "w_ih_t": w_ih.T,                 # (IN, 4H)
            "w_hh_t": w_hh.T,                 # (H, 4H)
            "bias": b_ih + b_hh,              # (4H,)
        })
    return params


# --------------------------- pure-JAX reference ----------------------------

def _reference_forward(x, params):
    x_tm = jnp.transpose(x, (1, 0, 2)).astype(jnp.float32)
    n_layers = len(params)
    for li, p in enumerate(params):
        H = p["w_hh_t"].shape[0]
        B = x_tm.shape[1]

        def step(carry, x_t, p=p, H=H):
            h, c = carry
            gates = x_t @ p["w_ih_t"] + h @ p["w_hh_t"] + p["bias"]
            i = jax.nn.sigmoid(gates[:, 0 * H:1 * H])
            f = jax.nn.sigmoid(gates[:, 1 * H:2 * H])
            g = jnp.tanh(gates[:, 2 * H:3 * H])
            o = jax.nn.sigmoid(gates[:, 3 * H:4 * H])
            c = f * c + i * g
            h = o * jnp.tanh(c)
            return (h, c), h

        init = (jnp.zeros((B, H), jnp.float32), jnp.zeros((B, H), jnp.float32))
        _, hs = jax.lax.scan(step, init, x_tm)
        x_tm = jnp.maximum(hs, 0.0) if li == n_layers - 1 else hs
    return jnp.transpose(x_tm, (1, 0, 2))


if __name__ == "__main__":
    # Small shapes consistent with the module: LSTM over a feature sequence.
    batch, seq, input_size, hidden_size, num_layers = 2, 8, 16, 32, 2

    key = jax.random.PRNGKey(0)
    key, kx = jax.random.split(key)
    x = jax.random.normal(kx, (batch, seq, input_size), jnp.float32)
    params = init_params(key, input_size, hidden_size, num_layers)

    ref = jax.block_until_ready(_reference_forward(x, params))

    # f32 compute path: tighter numerical check against the pure-JAX reference.
    out_f32 = jax.block_until_ready(
        encoder_rnn_forward(x, params, compute_dtype=jnp.float32))
    assert out_f32.shape == (batch, seq, hidden_size)
    np.testing.assert_allclose(np.asarray(out_f32), np.asarray(ref),
                               rtol=1e-2, atol=1e-2)

    # bf16 compute path (default perf configuration): looser tolerance.
    out = jax.block_until_ready(encoder_rnn_forward(x, params))
    assert out.shape == (batch, seq, hidden_size)
    assert bool(jnp.all(out >= 0.0))  # ReLU applied
    np.testing.assert_allclose(np.asarray(out), np.asarray(ref),
                               rtol=5e-2, atol=5e-2)

    # Chunked / multi-batch-block path: exercises time chunking (nt>1),
    # time padding, >1 batch block (state reset per block), partial unroll.
    b2, s2 = 10, 20
    key, kx2 = jax.random.split(key)
    x2 = jax.random.normal(kx2, (b2, s2, input_size), jnp.float32)
    ref2 = jax.block_until_ready(_reference_forward(x2, params))
    out2 = jax.block_until_ready(encoder_rnn_forward(
        x2, params, compute_dtype=jnp.float32, time_block=16, batch_block=8))
    assert out2.shape == (b2, s2, hidden_size)
    np.testing.assert_allclose(np.asarray(out2), np.asarray(ref2),
                               rtol=1e-2, atol=1e-2)

    print("KERNEL_OK")
</pallas_src>

<mosaic_0001>
module attributes {stable_mosaic.version = 11 : i64} {
  func.func @_fused_lstm_kernel(%arg0: i32, %arg1: i32, %arg2: memref<8x8x16xf32, #tpu.memory_space<vmem>>, %arg3: memref<16x128xf32, #tpu.memory_space<vmem>>, %arg4: memref<32x128xf32, #tpu.memory_space<vmem>>, %arg5: memref<1x128xf32, #tpu.memory_space<vmem>>, %arg6: memref<32x128xf32, #tpu.memory_space<vmem>>, %arg7: memref<32x128xf32, #tpu.memory_space<vmem>>, %arg8: memref<1x128xf32, #tpu.memory_space<vmem>>, %arg9: memref<8x8x32xf32, #tpu.memory_space<vmem>>, %arg10: memref<8x8x128xf32, #tpu.memory_space<vmem>>, %arg11: memref<8x8x32xf32, #tpu.memory_space<vmem>>, %arg12: memref<2x8x32xf32, #tpu.memory_space<vmem>>, %arg13: memref<2x8x32xf32, #tpu.memory_space<vmem>>) attributes {dimension_semantics = [#tpu.dimension_semantics<parallel>, #tpu.dimension_semantics<arbitrary>], iteration_bounds = array<i64: 1, 1>, scalar_prefetch = 0 : i64, scratch_operands = 4 : i64, tpu.core_type = #tpu.core_type<tc>, window_params = [{transform_indices = @transform_0, window_bounds = array<i64: 8, 8, 16>}, {pipeline_mode = #tpu.pipeline_mode<synchronous>, transform_indices = @transform_1, window_bounds = array<i64: 16, 128>}, {pipeline_mode = #tpu.pipeline_mode<synchronous>, transform_indices = @transform_2, window_bounds = array<i64: 32, 128>}, {pipeline_mode = #tpu.pipeline_mode<synchronous>, transform_indices = @transform_3, window_bounds = array<i64: 1, 128>}, {pipeline_mode = #tpu.pipeline_mode<synchronous>, transform_indices = @transform_4, window_bounds = array<i64: 32, 128>}, {pipeline_mode = #tpu.pipeline_mode<synchronous>, transform_indices = @transform_5, window_bounds = array<i64: 32, 128>}, {pipeline_mode = #tpu.pipeline_mode<synchronous>, transform_indices = @transform_6, window_bounds = array<i64: 1, 128>}, {transform_indices = @transform_7, window_bounds = array<i64: 8, 8, 32>}]} {
    %c0_i32 = arith.constant 0 : i32
    %0 = arith.cmpi eq, %arg1, %c0_i32 : i32
    %1 = arith.extui %0 : i1 to i32
    %c0_i32_0 = arith.constant 0 : i32
    %2 = arith.cmpi ne, %1, %c0_i32_0 : i32
    scf.if %2 {
      %cst_222 = arith.constant 0.000000e+00 : f32
      %617 = vector.broadcast %cst_222 : f32 to vector<2x8x32xf32>
      %c0_223 = arith.constant 0 : index
      %c0_224 = arith.constant 0 : index
      %c0_225 = arith.constant 0 : index
      %618 = vector.load %arg12[%c0_223, %c0_224, %c0_225] : memref<2x8x32xf32, #tpu.memory_space<vmem>>, vector<2x8x32xf32>
      tpu.vector_store %arg12[%c0_223, %c0_224, %c0_225], %617 {strides = array<i32>} : memref<2x8x32xf32, #tpu.memory_space<vmem>>, vector<2x8x32xf32>,
      %cst_226 = arith.constant 0.000000e+00 : f32
      %619 = vector.broadcast %cst_226 : f32 to vector<2x8x32xf32>
      %c0_227 = arith.constant 0 : index
      %c0_228 = arith.constant 0 : index
      %c0_229 = arith.constant 0 : index
      %620 = vector.load %arg13[%c0_227, %c0_228, %c0_229] : memref<2x8x32xf32, #tpu.memory_space<vmem>>, vector<2x8x32xf32>
      tpu.vector_store %arg13[%c0_227, %c0_228, %c0_229], %619 {strides = array<i32>} : memref<2x8x32xf32, #tpu.memory_space<vmem>>, vector<2x8x32xf32>,
    } else {
    }
    %c0 = arith.constant 0 : index
    %c0_1 = arith.constant 0 : index
    %c0_2 = arith.constant 0 : index
    %3 = vector.load %arg2[%c0, %c0_1, %c0_2] : memref<8x8x16xf32, #tpu.memory_space<vmem>>, vector<8x8x16xf32>
    %4 = vector.shape_cast %3 : vector<8x8x16xf32> to vector<64x16xf32>
    %c0_3 = arith.constant 0 : index
    %c0_4 = arith.constant 0 : index
    %5 = vector.load %arg3[%c0_3, %c0_4] : memref<16x128xf32, #tpu.memory_space<vmem>>, vector<16x128xf32>
    %cst = arith.constant dense<0.000000e+00> : vector<64x128xf32>
    %6 = tpu.matmul %4, %5, %cst {dimension_numbers = #tpu.dot_dimension_numbers<[1], [0], [0], [1], [0, 0, 1, 1], [], []>} : vector<64x16xf32>, vector<16x128xf32>, vector<64x128xf32> -> vector<64x128xf32>
    %c0_5 = arith.constant 0 : index
    %c0_6 = arith.constant 0 : index
    %7 = vector.load %arg5[%c0_5, %c0_6] : memref<1x128xf32, #tpu.memory_space<vmem>>, vector<1x128xf32>
    %8 = vector.broadcast %7 : vector<1x128xf32> to vector<64x128xf32>
    %9 = arith.addf %6, %8 : vector<64x128xf32>
    %10 = vector.shape_cast %9 : vector<64x128xf32> to vector<8x8x128xf32>
    %c0_7 = arith.constant 0 : index
    %c0_8 = arith.constant 0 : index
    %c0_9 = arith.constant 0 : index
    %11 = vector.load %arg10[%c0_7, %c0_8, %c0_9] : memref<8x8x128xf32, #tpu.memory_space<vmem>>, vector<8x8x128xf32>
    tpu.vector_store %arg10[%c0_7, %c0_8, %c0_9], %10 {strides = array<i32>} : memref<8x8x128xf32, #tpu.memory_space<vmem>>, vector<8x8x128xf32>,
    %c0_10 = arith.constant 0 : index
    %c0_11 = arith.constant 0 : index
    %c0_12 = arith.constant 0 : index
    %12 = vector.load %arg12[%c0_10, %c0_11, %c0_12] : memref<2x8x32xf32, #tpu.memory_space<vmem>>, vector<1x8x32xf32>
    %13 = vector.shape_cast %12 : vector<1x8x32xf32> to vector<8x32xf32>
    %c0_13 = arith.constant 0 : index
    %c0_14 = arith.constant 0 : index
    %c0_15 = arith.constant 0 : index
    %14 = vector.load %arg13[%c0_13, %c0_14, %c0_15] : memref<2x8x32xf32, #tpu.memory_space<vmem>>, vector<1x8x32xf32>
    %15 = vector.shape_cast %14 : vector<1x8x32xf32> to vector<8x32xf32>
    %c0_i32_16 = arith.constant 0 : i32
    %c0_17 = arith.constant 0 : index
    %c0_18 = arith.constant 0 : index
    %16 = vector.load %arg4[%c0_17, %c0_18] : memref<32x128xf32, #tpu.memory_space<vmem>>, vector<32x128xf32>
    %cst_19 = arith.constant dense<0.000000e+00> : vector<8x128xf32>
    %17 = tpu.matmul %13, %16, %cst_19 {dimension_numbers = #tpu.dot_dimension_numbers<[1], [0], [0], [1], [0, 0, 1, 1], [], []>} : vector<8x32xf32>, vector<32x128xf32>, vector<8x128xf32> -> vector<8x128xf32>
    %18 = arith.index_cast %c0_i32_16 : i32 to index
    %c0_20 = arith.constant 0 : index
    %c0_21 = arith.constant 0 : index
    %19 = vector.load %arg10[%18, %c0_20, %c0_21] : memref<8x8x128xf32, #tpu.memory_space<vmem>>, vector<1x8x128xf32>
    %20 = vector.shape_cast %19 : vector<1x8x128xf32> to vector<8x128xf32>
    %21 = arith.addf %17, %20 : vector<8x128xf32>
    %22 = vector.extract_strided_slice %21 {offsets = [0, 0], sizes = [8, 32], strides = [1, 1]} : vector<8x128xf32> to vector<8x32xf32>
    %23 = arith.negf %22 : vector<8x32xf32>
    %24 = math.exp %23 : vector<8x32xf32>
    %cst_22 = arith.constant 1.000000e+00 : f32
    %25 = vector.broadcast %cst_22 : f32 to vector<8x32xf32>
    %26 = arith.addf %25, %24 : vector<8x32xf32>
    %27 = arith.divf %25, %26 : vector<8x32xf32>
    %28 = vector.extract_strided_slice %21 {offsets = [0, 32], sizes = [8, 32], strides = [1, 1]} : vector<8x128xf32> to vector<8x32xf32>
    %29 = arith.negf %28 : vector<8x32xf32>
    %30 = math.exp %29 : vector<8x32xf32>
    %cst_23 = arith.constant 1.000000e+00 : f32
    %31 = vector.broadcast %cst_23 : f32 to vector<8x32xf32>
    %32 = arith.addf %31, %30 : vector<8x32xf32>
    %33 = arith.divf %31, %32 : vector<8x32xf32>
    %34 = vector.extract_strided_slice %21 {offsets = [0, 64], sizes = [8, 32], strides = [1, 1]} : vector<8x128xf32> to vector<8x32xf32>
    %35 = math.tanh %34 : vector<8x32xf32>
    %36 = vector.extract_strided_slice %21 {offsets = [0, 96], sizes = [8, 32], strides = [1, 1]} : vector<8x128xf32> to vector<8x32xf32>
    %37 = arith.negf %36 : vector<8x32xf32>
    %38 = math.exp %37 : vector<8x32xf32>
    %cst_24 = arith.constant 1.000000e+00 : f32
    %39 = vector.broadcast %cst_24 : f32 to vector<8x32xf32>
    %40 = arith.addf %39, %38 : vector<8x32xf32>
    %41 = arith.divf %39, %40 : vector<8x32xf32>
    %42 = arith.mulf %33, %15 : vector<8x32xf32>
    %43 = arith.mulf %27, %35 : vector<8x32xf32>
    %44 = arith.addf %42, %43 : vector<8x32xf32>
    %45 = math.tanh %44 : vector<8x32xf32>
    %46 = arith.mulf %41, %45 : vector<8x32xf32>
    %47 = arith.index_cast %c0_i32_16 : i32 to index
    %c0_25 = arith.constant 0 : index
    %c0_26 = arith.constant 0 : index
    %48 = vector.load %arg11[%47, %c0_25, %c0_26] : memref<8x8x32xf32, #tpu.memory_space<vmem>>, vector<1x8x32xf32>
    %49 = vector.shape_cast %48 : vector<1x8x32xf32> to vector<8x32xf32>
    %50 = vector.shape_cast %46 : vector<8x32xf32> to vector<1x8x32xf32>
    tpu.vector_store %arg11[%47, %c0_25, %c0_26], %50 {strides = array<i32>} : memref<8x8x32xf32, #tpu.memory_space<vmem>>, vector<1x8x32xf32>,
    %c1_i32 = arith.constant 1 : i32
    %c0_27 = arith.constant 0 : index
    %c0_28 = arith.constant 0 : index
    %51 = vector.load %arg4[%c0_27, %c0_28] : memref<32x128xf32, #tpu.memory_space<vmem>>, vector<32x128xf32>
    %cst_29 = arith.constant dense<0.000000e+00> : vector<8x128xf32>
    %52 = tpu.matmul %46, %51, %cst_29 {dimension_numbers = #tpu.dot_dimension_numbers<[1], [0], [0], [1], [0, 0, 1, 1], [], []>} : vector<8x32xf32>, vector<32x128xf32>, vector<8x128xf32> -> vector<8x128xf32>
    %53 = arith.index_cast %c1_i32 : i32 to index
    %c0_30 = arith.constant 0 : index
    %c0_31 = arith.constant 0 : index
    %54 = vector.load %arg10[%53, %c0_30, %c0_31] : memref<8x8x128xf32, #tpu.memory_space<vmem>>, vector<1x8x128xf32>
    %55 = vector.shape_cast %54 : vector<1x8x128xf32> to vector<8x128xf32>
    %56 = arith.addf %52, %55 : vector<8x128xf32>
    %57 = vector.extract_strided_slice %56 {offsets = [0, 0], sizes = [8, 32], strides = [1, 1]} : vector<8x128xf32> to vector<8x32xf32>
    %58 = arith.negf %57 : vector<8x32xf32>
    %59 = math.exp %58 : vector<8x32xf32>
    %cst_32 = arith.constant 1.000000e+00 : f32
    %60 = vector.broadcast %cst_32 : f32 to vector<8x32xf32>
    %61 = arith.addf %60, %59 : vector<8x32xf32>
    %62 = arith.divf %60, %61 : vector<8x32xf32>
    %63 = vector.extract_strided_slice %56 {offsets = [0, 32], sizes = [8, 32], strides = [1, 1]} : vector<8x128xf32> to vector<8x32xf32>
    %64 = arith.negf %63 : vector<8x32xf32>
    %65 = math.exp %64 : vector<8x32xf32>
    %cst_33 = arith.constant 1.000000e+00 : f32
    %66 = vector.broadcast %cst_33 : f32 to vector<8x32xf32>
    %67 = arith.addf %66, %65 : vector<8x32xf32>
    %68 = arith.divf %66, %67 : vector<8x32xf32>
    %69 = vector.extract_strided_slice %56 {offsets = [0, 64], sizes = [8, 32], strides = [1, 1]} : vector<8x128xf32> to vector<8x32xf32>
    %70 = math.tanh %69 : vector<8x32xf32>
    %71 = vector.extract_strided_slice %56 {offsets = [0, 96], sizes = [8, 32], strides = [1, 1]} : vector<8x128xf32> to vector<8x32xf32>
    %72 = arith.negf %71 : vector<8x32xf32>
    %73 = math.exp %72 : vector<8x32xf32>
    %cst_34 = arith.constant 1.000000e+00 : f32
    %74 = vector.broadcast %cst_34 : f32 to vector<8x32xf32>
    %75 = arith.addf %74, %73 : vector<8x32xf32>
    %76 = arith.divf %74, %75 : vector<8x32xf32>
    %77 = arith.mulf %68, %44 : vector<8x32xf32>
    %78 = arith.mulf %62, %70 : vector<8x32xf32>
    %79 = arith.addf %77, %78 : vector<8x32xf32>
    %80 = math.tanh %79 : vector<8x32xf32>
    %81 = arith.mulf %76, %80 : vector<8x32xf32>
    %82 = arith.index_cast %c1_i32 : i32 to index
    %c0_35 = arith.constant 0 : index
    %c0_36 = arith.constant 0 : index
    %83 = vector.load %arg11[%82, %c0_35, %c0_36] : memref<8x8x32xf32, #tpu.memory_space<vmem>>, vector<1x8x32xf32>
    %84 = vector.shape_cast %83 : vector<1x8x32xf32> to vector<8x32xf32>
    %85 = vector.shape_cast %81 : vector<8x32xf32> to vector<1x8x32xf32>
    tpu.vector_store %arg11[%82, %c0_35, %c0_36], %85 {strides = array<i32>} : memref<8x8x32xf32, #tpu.memory_space<vmem>>, vector<1x8x32xf32>,
    %c2_i32 = arith.constant 2 : i32
    %c0_37 = arith.constant 0 : index
    %c0_38 = arith.constant 0 : index
    %86 = vector.load %arg4[%c0_37, %c0_38] : memref<32x128xf32, #tpu.memory_space<vmem>>, vector<32x128xf32>
    %cst_39 = arith.constant dense<0.000000e+00> : vector<8x128xf32>
    %87 = tpu.matmul %81, %86, %cst_39 {dimension_numbers = #tpu.dot_dimension_numbers<[1], [0], [0], [1], [0, 0, 1, 1], [], []>} : vector<8x32xf32>, vector<32x128xf32>, vector<8x128xf32> -> vector<8x128xf32>
    %88 = arith.index_cast %c2_i32 : i32 to index
    %c0_40 = arith.constant 0 : index
    %c0_41 = arith.constant 0 : index
    %89 = vector.load %arg10[%88, %c0_40, %c0_41] : memref<8x8x128xf32, #tpu.memory_space<vmem>>, vector<1x8x128xf32>
    %90 = vector.shape_cast %89 : vector<1x8x128xf32> to vector<8x128xf32>
    %91 = arith.addf %87, %90 : vector<8x128xf32>
    %92 = vector.extract_strided_slice %91 {offsets = [0, 0], sizes = [8, 32], strides = [1, 1]} : vector<8x128xf32> to vector<8x32xf32>
    %93 = arith.negf %92 : vector<8x32xf32>
    %94 = math.exp %93 : vector<8x32xf32>
    %cst_42 = arith.constant 1.000000e+00 : f32
    %95 = vector.broadcast %cst_42 : f32 to vector<8x32xf32>
    %96 = arith.addf %95, %94 : vector<8x32xf32>
    %97 = arith.divf %95, %96 : vector<8x32xf32>
    %98 = vector.extract_strided_slice %91 {offsets = [0, 32], sizes = [8, 32], strides = [1, 1]} : vector<8x128xf32> to vector<8x32xf32>
    %99 = arith.negf %98 : vector<8x32xf32>
    %100 = math.exp %99 : vector<8x32xf32>
    %cst_43 = arith.constant 1.000000e+00 : f32
    %101 = vector.broadcast %cst_43 : f32 to vector<8x32xf32>
    %102 = arith.addf %101, %100 : vector<8x32xf32>
    %103 = arith.divf %101, %102 : vector<8x32xf32>
    %104 = vector.extract_strided_slice %91 {offsets = [0, 64], sizes = [8, 32], strides = [1, 1]} : vector<8x128xf32> to vector<8x32xf32>
    %105 = math.tanh %104 : vector<8x32xf32>
    %106 = vector.extract_strided_slice %91 {offsets = [0, 96], sizes = [8, 32], strides = [1, 1]} : vector<8x128xf32> to vector<8x32xf32>
    %107 = arith.negf %106 : vector<8x32xf32>
    %108 = math.exp %107 : vector<8x32xf32>
    %cst_44 = arith.constant 1.000000e+00 : f32
    %109 = vector.broadcast %cst_44 : f32 to vector<8x32xf32>
    %110 = arith.addf %109, %108 : vector<8x32xf32>
    %111 = arith.divf %109, %110 : vector<8x32xf32>
    %112 = arith.mulf %103, %79 : vector<8x32xf32>
    %113 = arith.mulf %97, %105 : vector<8x32xf32>
    %114 = arith.addf %112, %113 : vector<8x32xf32>
    %115 = math.tanh %114 : vector<8x32xf32>
    %116 = arith.mulf %111, %115 : vector<8x32xf32>
    %117 = arith.index_cast %c2_i32 : i32 to index
    %c0_45 = arith.constant 0 : index
    %c0_46 = arith.constant 0 : index
    %118 = vector.load %arg11[%117, %c0_45, %c0_46] : memref<8x8x32xf32, #tpu.memory_space<vmem>>, vector<1x8x32xf32>
    %119 = vector.shape_cast %118 : vector<1x8x32xf32> to vector<8x32xf32>
    %120 = vector.shape_cast %116 : vector<8x32xf32> to vector<1x8x32xf32>
    tpu.vector_store %arg11[%117, %c0_45, %c0_46], %120 {strides = array<i32>} : memref<8x8x32xf32, #tpu.memory_space<vmem>>, vector<1x8x32xf32>,
    %c3_i32 = arith.constant 3 : i32
    %c0_47 = arith.constant 0 : index
    %c0_48 = arith.constant 0 : index
    %121 = vector.load %arg4[%c0_47, %c0_48] : memref<32x128xf32, #tpu.memory_space<vmem>>, vector<32x128xf32>
    %cst_49 = arith.constant dense<0.000000e+00> : vector<8x128xf32>
    %122 = tpu.matmul %116, %121, %cst_49 {dimension_numbers = #tpu.dot_dimension_numbers<[1], [0], [0], [1], [0, 0, 1, 1], [], []>} : vector<8x32xf32>, vector<32x128xf32>, vector<8x128xf32> -> vector<8x128xf32>
    %123 = arith.index_cast %c3_i32 : i32 to index
    %c0_50 = arith.constant 0 : index
    %c0_51 = arith.constant 0 : index
    %124 = vector.load %arg10[%123, %c0_50, %c0_51] : memref<8x8x128xf32, #tpu.memory_space<vmem>>, vector<1x8x128xf32>
    %125 = vector.shape_cast %124 : vector<1x8x128xf32> to vector<8x128xf32>
    %126 = arith.addf %122, %125 : vector<8x128xf32>
    %127 = vector.extract_strided_slice %126 {offsets = [0, 0], sizes = [8, 32], strides = [1, 1]} : vector<8x128xf32> to vector<8x32xf32>
    %128 = arith.negf %127 : vector<8x32xf32>
    %129 = math.exp %128 : vector<8x32xf32>
    %cst_52 = arith.constant 1.000000e+00 : f32
    %130 = vector.broadcast %cst_52 : f32 to vector<8x32xf32>
    %131 = arith.addf %130, %129 : vector<8x32xf32>
    %132 = arith.divf %130, %131 : vector<8x32xf32>
    %133 = vector.extract_strided_slice %126 {offsets = [0, 32], sizes = [8, 32], strides = [1, 1]} : vector<8x128xf32> to vector<8x32xf32>
    %134 = arith.negf %133 : vector<8x32xf32>
    %135 = math.exp %134 : vector<8x32xf32>
    %cst_53 = arith.constant 1.000000e+00 : f32
    %136 = vector.broadcast %cst_53 : f32 to vector<8x32xf32>
    %137 = arith.addf %136, %135 : vector<8x32xf32>
    %138 = arith.divf %136, %137 : vector<8x32xf32>
    %139 = vector.extract_strided_slice %126 {offsets = [0, 64], sizes = [8, 32], strides = [1, 1]} : vector<8x128xf32> to vector<8x32xf32>
    %140 = math.tanh %139 : vector<8x32xf32>
    %141 = vector.extract_strided_slice %126 {offsets = [0, 96], sizes = [8, 32], strides = [1, 1]} : vector<8x128xf32> to vector<8x32xf32>
    %142 = arith.negf %141 : vector<8x32xf32>
    %143 = math.exp %142 : vector<8x32xf32>
    %cst_54 = arith.constant 1.000000e+00 : f32
    %144 = vector.broadcast %cst_54 : f32 to vector<8x32xf32>
    %145 = arith.addf %144, %143 : vector<8x32xf32>
    %146 = arith.divf %144, %145 : vector<8x32xf32>
    %147 = arith.mulf %138, %114 : vector<8x32xf32>
    %148 = arith.mulf %132, %140 : vector<8x32xf32>
    %149 = arith.addf %147, %148 : vector<8x32xf32>
    %150 = math.tanh %149 : vector<8x32xf32>
    %151 = arith.mulf %146, %150 : vector<8x32xf32>
    %152 = arith.index_cast %c3_i32 : i32 to index
    %c0_55 = arith.constant 0 : index
    %c0_56 = arith.constant 0 : index
    %153 = vector.load %arg11[%152, %c0_55, %c0_56] : memref<8x8x32xf32, #tpu.memory_space<vmem>>, vector<1x8x32xf32>
    %154 = vector.shape_cast %153 : vector<1x8x32xf32> to vector<8x32xf32>
    %155 = vector.shape_cast %151 : vector<8x32xf32> to vector<1x8x32xf32>
    tpu.vector_store %arg11[%152, %c0_55, %c0_56], %155 {strides = array<i32>} : memref<8x8x32xf32, #tpu.memory_space<vmem>>, vector<1x8x32xf32>,
    %c4_i32 = arith.constant 4 : i32
    %c0_57 = arith.constant 0 : index
    %c0_58 = arith.constant 0 : index
    %156 = vector.load %arg4[%c0_57, %c0_58] : memref<32x128xf32, #tpu.memory_space<vmem>>, vector<32x128xf32>
    %cst_59 = arith.constant dense<0.000000e+00> : vector<8x128xf32>
    %157 = tpu.matmul %151, %156, %cst_59 {dimension_numbers = #tpu.dot_dimension_numbers<[1], [0], [0], [1], [0, 0, 1, 1], [], []>} : vector<8x32xf32>, vector<32x128xf32>, vector<8x128xf32> -> vector<8x128xf32>
    %158 = arith.index_cast %c4_i32 : i32 to index
    %c0_60 = arith.constant 0 : index
    %c0_61 = arith.constant 0 : index
    %159 = vector.load %arg10[%158, %c0_60, %c0_61] : memref<8x8x128xf32, #tpu.memory_space<vmem>>, vector<1x8x128xf32>
    %160 = vector.shape_cast %159 : vector<1x8x128xf32> to vector<8x128xf32>
    %161 = arith.addf %157, %160 : vector<8x128xf32>
    %162 = vector.extract_strided_slice %161 {offsets = [0, 0], sizes = [8, 32], strides = [1, 1]} : vector<8x128xf32> to vector<8x32xf32>
    %163 = arith.negf %162 : vector<8x32xf32>
    %164 = math.exp %163 : vector<8x32xf32>
    %cst_62 = arith.constant 1.000000e+00 : f32
    %165 = vector.broadcast %cst_62 : f32 to vector<8x32xf32>
    %166 = arith.addf %165, %164 : vector<8x32xf32>
    %167 = arith.divf %165, %166 : vector<8x32xf32>
    %168 = vector.extract_strided_slice %161 {offsets = [0, 32], sizes = [8, 32], strides = [1, 1]} : vector<8x128xf32> to vector<8x32xf32>
    %169 = arith.negf %168 : vector<8x32xf32>
    %170 = math.exp %169 : vector<8x32xf32>
    %cst_63 = arith.constant 1.000000e+00 : f32
    %171 = vector.broadcast %cst_63 : f32 to vector<8x32xf32>
    %172 = arith.addf %171, %170 : vector<8x32xf32>
    %173 = arith.divf %171, %172 : vector<8x32xf32>
    %174 = vector.extract_strided_slice %161 {offsets = [0, 64], sizes = [8, 32], strides = [1, 1]} : vector<8x128xf32> to vector<8x32xf32>
    %175 = math.tanh %174 : vector<8x32xf32>
    %176 = vector.extract_strided_slice %161 {offsets = [0, 96], sizes = [8, 32], strides = [1, 1]} : vector<8x128xf32> to vector<8x32xf32>
    %177 = arith.negf %176 : vector<8x32xf32>
    %178 = math.exp %177 : vector<8x32xf32>
    %cst_64 = arith.constant 1.000000e+00 : f32
    %179 = vector.broadcast %cst_64 : f32 to vector<8x32xf32>
    %180 = arith.addf %179, %178 : vector<8x32xf32>
    %181 = arith.divf %179, %180 : vector<8x32xf32>
    %182 = arith.mulf %173, %149 : vector<8x32xf32>
    %183 = arith.mulf %167, %175 : vector<8x32xf32>
    %184 = arith.addf %182, %183 : vector<8x32xf32>
    %185 = math.tanh %184 : vector<8x32xf32>
    %186 = arith.mulf %181, %185 : vector<8x32xf32>
    %187 = arith.index_cast %c4_i32 : i32 to index
    %c0_65 = arith.constant 0 : index
    %c0_66 = arith.constant 0 : index
    %188 = vector.load %arg11[%187, %c0_65, %c0_66] : memref<8x8x32xf32, #tpu.memory_space<vmem>>, vector<1x8x32xf32>
    %189 = vector.shape_cast %188 : vector<1x8x32xf32> to vector<8x32xf32>
    %190 = vector.shape_cast %186 : vector<8x32xf32> to vector<1x8x32xf32>
    tpu.vector_store %arg11[%187, %c0_65, %c0_66], %190 {strides = array<i32>} : memref<8x8x32xf32, #tpu.memory_space<vmem>>, vector<1x8x32xf32>,
    %c5_i32 = arith.constant 5 : i32
    %c0_67 = arith.constant 0 : index
    %c0_68 = arith.constant 0 : index
    %191 = vector.load %arg4[%c0_67, %c0_68] : memref<32x128xf32, #tpu.memory_space<vmem>>, vector<32x128xf32>
    %cst_69 = arith.constant dense<0.000000e+00> : vector<8x128xf32>
    %192 = tpu.matmul %186, %191, %cst_69 {dimension_numbers = #tpu.dot_dimension_numbers<[1], [0], [0], [1], [0, 0, 1, 1], [], []>} : vector<8x32xf32>, vector<32x128xf32>, vector<8x128xf32> -> vector<8x128xf32>
    %193 = arith.index_cast %c5_i32 : i32 to index
    %c0_70 = arith.constant 0 : index
    %c0_71 = arith.constant 0 : index
    %194 = vector.load %arg10[%193, %c0_70, %c0_71] : memref<8x8x128xf32, #tpu.memory_space<vmem>>, vector<1x8x128xf32>
    %195 = vector.shape_cast %194 : vector<1x8x128xf32> to vector<8x128xf32>
    %196 = arith.addf %192, %195 : vector<8x128xf32>
    %197 = vector.extract_strided_slice %196 {offsets = [0, 0], sizes = [8, 32], strides = [1, 1]} : vector<8x128xf32> to vector<8x32xf32>
    %198 = arith.negf %197 : vector<8x32xf32>
    %199 = math.exp %198 : vector<8x32xf32>
    %cst_72 = arith.constant 1.000000e+00 : f32
    %200 = vector.broadcast %cst_72 : f32 to vector<8x32xf32>
    %201 = arith.addf %200, %199 : vector<8x32xf32>
    %202 = arith.divf %200, %201 : vector<8x32xf32>
    %203 = vector.extract_strided_slice %196 {offsets = [0, 32], sizes = [8, 32], strides = [1, 1]} : vector<8x128xf32> to vector<8x32xf32>
    %204 = arith.negf %203 : vector<8x32xf32>
    %205 = math.exp %204 : vector<8x32xf32>
    %cst_73 = arith.constant 1.000000e+00 : f32
    %206 = vector.broadcast %cst_73 : f32 to vector<8x32xf32>
    %207 = arith.addf %206, %205 : vector<8x32xf32>
    %208 = arith.divf %206, %207 : vector<8x32xf32>
    %209 = vector.extract_strided_slice %196 {offsets = [0, 64], sizes = [8, 32], strides = [1, 1]} : vector<8x128xf32> to vector<8x32xf32>
    %210 = math.tanh %209 : vector<8x32xf32>
    %211 = vector.extract_strided_slice %196 {offsets = [0, 96], sizes = [8, 32], strides = [1, 1]} : vector<8x128xf32> to vector<8x32xf32>
    %212 = arith.negf %211 : vector<8x32xf32>
    %213 = math.exp %212 : vector<8x32xf32>
    %cst_74 = arith.constant 1.000000e+00 : f32
    %214 = vector.broadcast %cst_74 : f32 to vector<8x32xf32>
    %215 = arith.addf %214, %213 : vector<8x32xf32>
    %216 = arith.divf %214, %215 : vector<8x32xf32>
    %217 = arith.mulf %208, %184 : vector<8x32xf32>
    %218 = arith.mulf %202, %210 : vector<8x32xf32>
    %219 = arith.addf %217, %218 : vector<8x32xf32>
    %220 = math.tanh %219 : vector<8x32xf32>
    %221 = arith.mulf %216, %220 : vector<8x32xf32>
    %222 = arith.index_cast %c5_i32 : i32 to index
    %c0_75 = arith.constant 0 : index
    %c0_76 = arith.constant 0 : index
    %223 = vector.load %arg11[%222, %c0_75, %c0_76] : memref<8x8x32xf32, #tpu.memory_space<vmem>>, vector<1x8x32xf32>
    %224 = vector.shape_cast %223 : vector<1x8x32xf32> to vector<8x32xf32>
    %225 = vector.shape_cast %221 : vector<8x32xf32> to vector<1x8x32xf32>
    tpu.vector_store %arg11[%222, %c0_75, %c0_76], %225 {strides = array<i32>} : memref<8x8x32xf32, #tpu.memory_space<vmem>>, vector<1x8x32xf32>,
    %c6_i32 = arith.constant 6 : i32
    %c0_77 = arith.constant 0 : index
    %c0_78 = arith.constant 0 : index
    %226 = vector.load %arg4[%c0_77, %c0_78] : memref<32x128xf32, #tpu.memory_space<vmem>>, vector<32x128xf32>
    %cst_79 = arith.constant dense<0.000000e+00> : vector<8x128xf32>
    %227 = tpu.matmul %221, %226, %cst_79 {dimension_numbers = #tpu.dot_dimension_numbers<[1], [0], [0], [1], [0, 0, 1, 1], [], []>} : vector<8x32xf32>, vector<32x128xf32>, vector<8x128xf32> -> vector<8x128xf32>
    %228 = arith.index_cast %c6_i32 : i32 to index
    %c0_80 = arith.constant 0 : index
    %c0_81 = arith.constant 0 : index
    %229 = vector.load %arg10[%228, %c0_80, %c0_81] : memref<8x8x128xf32, #tpu.memory_space<vmem>>, vector<1x8x128xf32>
    %230 = vector.shape_cast %229 : vector<1x8x128xf32> to vector<8x128xf32>
    %231 = arith.addf %227, %230 : vector<8x128xf32>
    %232 = vector.extract_strided_slice %231 {offsets = [0, 0], sizes = [8, 32], strides = [1, 1]} : vector<8x128xf32> to vector<8x32xf32>
    %233 = arith.negf %232 : vector<8x32xf32>
    %234 = math.exp %233 : vector<8x32xf32>
    %cst_82 = arith.constant 1.000000e+00 : f32
    %235 = vector.broadcast %cst_82 : f32 to vector<8x32xf32>
    %236 = arith.addf %235, %234 : vector<8x32xf32>
    %237 = arith.divf %235, %236 : vector<8x32xf32>
    %238 = vector.extract_strided_slice %231 {offsets = [0, 32], sizes = [8, 32], strides = [1, 1]} : vector<8x128xf32> to vector<8x32xf32>
    %239 = arith.negf %238 : vector<8x32xf32>
    %240 = math.exp %239 : vector<8x32xf32>
    %cst_83 = arith.constant 1.000000e+00 : f32
    %241 = vector.broadcast %cst_83 : f32 to vector<8x32xf32>
    %242 = arith.addf %241, %240 : vector<8x32xf32>
    %243 = arith.divf %241, %242 : vector<8x32xf32>
    %244 = vector.extract_strided_slice %231 {offsets = [0, 64], sizes = [8, 32], strides = [1, 1]} : vector<8x128xf32> to vector<8x32xf32>
    %245 = math.tanh %244 : vector<8x32xf32>
    %246 = vector.extract_strided_slice %231 {offsets = [0, 96], sizes = [8, 32], strides = [1, 1]} : vector<8x128xf32> to vector<8x32xf32>
    %247 = arith.negf %246 : vector<8x32xf32>
    %248 = math.exp %247 : vector<8x32xf32>
    %cst_84 = arith.constant 1.000000e+00 : f32
    %249 = vector.broadcast %cst_84 : f32 to vector<8x32xf32>
    %250 = arith.addf %249, %248 : vector<8x32xf32>
    %251 = arith.divf %249, %250 : vector<8x32xf32>
    %252 = arith.mulf %243, %219 : vector<8x32xf32>
    %253 = arith.mulf %237, %245 : vector<8x32xf32>
    %254 = arith.addf %252, %253 : vector<8x32xf32>
    %255 = math.tanh %254 : vector<8x32xf32>
    %256 = arith.mulf %251, %255 : vector<8x32xf32>
    %257 = arith.index_cast %c6_i32 : i32 to index
    %c0_85 = arith.constant 0 : index
    %c0_86 = arith.constant 0 : index
    %258 = vector.load %arg11[%257, %c0_85, %c0_86] : memref<8x8x32xf32, #tpu.memory_space<vmem>>, vector<1x8x32xf32>
    %259 = vector.shape_cast %258 : vector<1x8x32xf32> to vector<8x32xf32>
    %260 = vector.shape_cast %256 : vector<8x32xf32> to vector<1x8x32xf32>
    tpu.vector_store %arg11[%257, %c0_85, %c0_86], %260 {strides = array<i32>} : memref<8x8x32xf32, #tpu.memory_space<vmem>>, vector<1x8x32xf32>,
    %c7_i32 = arith.constant 7 : i32
    %c0_87 = arith.constant 0 : index
    %c0_88 = arith.constant 0 : index
    %261 = vector.load %arg4[%c0_87, %c0_88] : memref<32x128xf32, #tpu.memory_space<vmem>>, vector<32x128xf32>
    %cst_89 = arith.constant dense<0.000000e+00> : vector<8x128xf32>
    %262 = tpu.matmul %256, %261, %cst_89 {dimension_numbers = #tpu.dot_dimension_numbers<[1], [0], [0], [1], [0, 0, 1, 1], [], []>} : vector<8x32xf32>, vector<32x128xf32>, vector<8x128xf32> -> vector<8x128xf32>
    %263 = arith.index_cast %c7_i32 : i32 to index
    %c0_90 = arith.constant 0 : index
    %c0_91 = arith.constant 0 : index
    %264 = vector.load %arg10[%263, %c0_90, %c0_91] : memref<8x8x128xf32, #tpu.memory_space<vmem>>, vector<1x8x128xf32>
    %265 = vector.shape_cast %264 : vector<1x8x128xf32> to vector<8x128xf32>
    %266 = arith.addf %262, %265 : vector<8x128xf32>
    %267 = vector.extract_strided_slice %266 {offsets = [0, 0], sizes = [8, 32], strides = [1, 1]} : vector<8x128xf32> to vector<8x32xf32>
    %268 = arith.negf %267 : vector<8x32xf32>
    %269 = math.exp %268 : vector<8x32xf32>
    %cst_92 = arith.constant 1.000000e+00 : f32
    %270 = vector.broadcast %cst_92 : f32 to vector<8x32xf32>
    %271 = arith.addf %270, %269 : vector<8x32xf32>
    %272 = arith.divf %270, %271 : vector<8x32xf32>
    %273 = vector.extract_strided_slice %266 {offsets = [0, 32], sizes = [8, 32], strides = [1, 1]} : vector<8x128xf32> to vector<8x32xf32>
    %274 = arith.negf %273 : vector<8x32xf32>
    %275 = math.exp %274 : vector<8x32xf32>
    %cst_93 = arith.constant 1.000000e+00 : f32
    %276 = vector.broadcast %cst_93 : f32 to vector<8x32xf32>
    %277 = arith.addf %276, %275 : vector<8x32xf32>
    %278 = arith.divf %276, %277 : vector<8x32xf32>
    %279 = vector.extract_strided_slice %266 {offsets = [0, 64], sizes = [8, 32], strides = [1, 1]} : vector<8x128xf32> to vector<8x32xf32>
    %280 = math.tanh %279 : vector<8x32xf32>
    %281 = vector.extract_strided_slice %266 {offsets = [0, 96], sizes = [8, 32], strides = [1, 1]} : vector<8x128xf32> to vector<8x32xf32>
    %282 = arith.negf %281 : vector<8x32xf32>
    %283 = math.exp %282 : vector<8x32xf32>
    %cst_94 = arith.constant 1.000000e+00 : f32
    %284 = vector.broadcast %cst_94 : f32 to vector<8x32xf32>
    %285 = arith.addf %284, %283 : vector<8x32xf32>
    %286 = arith.divf %284, %285 : vector<8x32xf32>
    %287 = arith.mulf %278, %254 : vector<8x32xf32>
    %288 = arith.mulf %272, %280 : vector<8x32xf32>
    %289 = arith.addf %287, %288 : vector<8x32xf32>
    %290 = math.tanh %289 : vector<8x32xf32>
    %291 = arith.mulf %286, %290 : vector<8x32xf32>
    %292 = arith.index_cast %c7_i32 : i32 to index
    %c0_95 = arith.constant 0 : index
    %c0_96 = arith.constant 0 : index
    %293 = vector.load %arg11[%292, %c0_95, %c0_96] : memref<8x8x32xf32, #tpu.memory_space<vmem>>, vector<1x8x32xf32>
    %294 = vector.shape_cast %293 : vector<1x8x32xf32> to vector<8x32xf32>
    %295 = vector.shape_cast %291 : vector<8x32xf32> to vector<1x8x32xf32>
    tpu.vector_store %arg11[%292, %c0_95, %c0_96], %295 {strides = array<i32>} : memref<8x8x32xf32, #tpu.memory_space<vmem>>, vector<1x8x32xf32>,
    %c8_i32 = arith.constant 8 : i32
    %c0_97 = arith.constant 0 : index
    %c0_98 = arith.constant 0 : index
    %c0_99 = arith.constant 0 : index
    %296 = vector.load %arg12[%c0_97, %c0_98, %c0_99] : memref<2x8x32xf32, #tpu.memory_space<vmem>>, vector<1x8x32xf32>
    %297 = vector.shape_cast %296 : vector<1x8x32xf32> to vector<8x32xf32>
    %298 = vector.shape_cast %291 : vector<8x32xf32> to vector<1x8x32xf32>
    tpu.vector_store %arg12[%c0_97, %c0_98, %c0_99], %298 {strides = array<i32>} : memref<2x8x32xf32, #tpu.memory_space<vmem>>, vector<1x8x32xf32>,
    %c0_100 = arith.constant 0 : index
    %c0_101 = arith.constant 0 : index
    %c0_102 = arith.constant 0 : index
    %299 = vector.load %arg13[%c0_100, %c0_101, %c0_102] : memref<2x8x32xf32, #tpu.memory_space<vmem>>, vector<1x8x32xf32>
    %300 = vector.shape_cast %299 : vector<1x8x32xf32> to vector<8x32xf32>
    %301 = vector.shape_cast %289 : vector<8x32xf32> to vector<1x8x32xf32>
    tpu.vector_store %arg13[%c0_100, %c0_101, %c0_102], %301 {strides = array<i32>} : memref<2x8x32xf32, #tpu.memory_space<vmem>>, vector<1x8x32xf32>,
    %c0_103 = arith.constant 0 : index
    %c0_104 = arith.constant 0 : index
    %c0_105 = arith.constant 0 : index
    %302 = vector.load %arg11[%c0_103, %c0_104, %c0_105] : memref<8x8x32xf32, #tpu.memory_space<vmem>>, vector<8x8x32xf32>
    %303 = vector.shape_cast %302 : vector<8x8x32xf32> to vector<64x32xf32>
    %c0_106 = arith.constant 0 : index
    %c0_107 = arith.constant 0 : index
    %304 = vector.load %arg6[%c0_106, %c0_107] : memref<32x128xf32, #tpu.memory_space<vmem>>, vector<32x128xf32>
    %cst_108 = arith.constant dense<0.000000e+00> : vector<64x128xf32>
    %305 = tpu.matmul %303, %304, %cst_108 {dimension_numbers = #tpu.dot_dimension_numbers<[1], [0], [0], [1], [0, 0, 1, 1], [], []>} : vector<64x32xf32>, vector<32x128xf32>, vector<64x128xf32> -> vector<64x128xf32>
    %c0_109 = arith.constant 0 : index
    %c0_110 = arith.constant 0 : index
    %306 = vector.load %arg8[%c0_109, %c0_110] : memref<1x128xf32, #tpu.memory_space<vmem>>, vector<1x128xf32>
    %307 = vector.broadcast %306 : vector<1x128xf32> to vector<64x128xf32>
    %308 = arith.addf %305, %307 : vector<64x128xf32>
    %309 = vector.shape_cast %308 : vector<64x128xf32> to vector<8x8x128xf32>
    %c0_111 = arith.constant 0 : index
    %c0_112 = arith.constant 0 : index
    %c0_113 = arith.constant 0 : index
    %310 = vector.load %arg10[%c0_111, %c0_112, %c0_113] : memref<8x8x128xf32, #tpu.memory_space<vmem>>, vector<8x8x128xf32>
    tpu.vector_store %arg10[%c0_111, %c0_112, %c0_113], %309 {strides = array<i32>} : memref<8x8x128xf32, #tpu.memory_space<vmem>>, vector<8x8x128xf32>,
    %c1 = arith.constant 1 : index
    %c0_114 = arith.constant 0 : index
    %c0_115 = arith.constant 0 : index
    %311 = vector.load %arg12[%c1, %c0_114, %c0_115] : memref<2x8x32xf32, #tpu.memory_space<vmem>>, vector<1x8x32xf32>
    %312 = vector.shape_cast %311 : vector<1x8x32xf32> to vector<8x32xf32>
    %c1_116 = arith.constant 1 : index
    %c0_117 = arith.constant 0 : index
    %c0_118 = arith.constant 0 : index
    %313 = vector.load %arg13[%c1_116, %c0_117, %c0_118] : memref<2x8x32xf32, #tpu.memory_space<vmem>>, vector<1x8x32xf32>
    %314 = vector.shape_cast %313 : vector<1x8x32xf32> to vector<8x32xf32>
    %c0_i32_119 = arith.constant 0 : i32
    %c0_120 = arith.constant 0 : index
    %c0_121 = arith.constant 0 : index
    %315 = vector.load %arg7[%c0_120, %c0_121] : memref<32x128xf32, #tpu.memory_space<vmem>>, vector<32x128xf32>
    %cst_122 = arith.constant dense<0.000000e+00> : vector<8x128xf32>
    %316 = tpu.matmul %312, %315, %cst_122 {dimension_numbers = #tpu.dot_dimension_numbers<[1], [0], [0], [1], [0, 0, 1, 1], [], []>} : vector<8x32xf32>, vector<32x128xf32>, vector<8x128xf32> -> vector<8x128xf32>
    %317 = arith.index_cast %c0_i32_119 : i32 to index
    %c0_123 = arith.constant 0 : index
    %c0_124 = arith.constant 0 : index
    %318 = vector.load %arg10[%317, %c0_123, %c0_124] : memref<8x8x128xf32, #tpu.memory_space<vmem>>, vector<1x8x128xf32>
    %319 = vector.shape_cast %318 : vector<1x8x128xf32> to vector<8x128xf32>
    %320 = arith.addf %316, %319 : vector<8x128xf32>
    %321 = vector.extract_strided_slice %320 {offsets = [0, 0], sizes = [8, 32], strides = [1, 1]} : vector<8x128xf32> to vector<8x32xf32>
    %322 = arith.negf %321 : vector<8x32xf32>
    %323 = math.exp %322 : vector<8x32xf32>
    %cst_125 = arith.constant 1.000000e+00 : f32
    %324 = vector.broadcast %cst_125 : f32 to vector<8x32xf32>
    %325 = arith.addf %324, %323 : vector<8x32xf32>
    %326 = arith.divf %324, %325 : vector<8x32xf32>
    %327 = vector.extract_strided_slice %320 {offsets = [0, 32], sizes = [8, 32], strides = [1, 1]} : vector<8x128xf32> to vector<8x32xf32>
    %328 = arith.negf %327 : vector<8x32xf32>
    %329 = math.exp %328 : vector<8x32xf32>
    %cst_126 = arith.constant 1.000000e+00 : f32
    %330 = vector.broadcast %cst_126 : f32 to vector<8x32xf32>
    %331 = arith.addf %330, %329 : vector<8x32xf32>
    %332 = arith.divf %330, %331 : vector<8x32xf32>
    %333 = vector.extract_strided_slice %320 {offsets = [0, 64], sizes = [8, 32], strides = [1, 1]} : vector<8x128xf32> to vector<8x32xf32>
    %334 = math.tanh %333 : vector<8x32xf32>
    %335 = vector.extract_strided_slice %320 {offsets = [0, 96], sizes = [8, 32], strides = [1, 1]} : vector<8x128xf32> to vector<8x32xf32>
    %336 = arith.negf %335 : vector<8x32xf32>
    %337 = math.exp %336 : vector<8x32xf32>
    %cst_127 = arith.constant 1.000000e+00 : f32
    %338 = vector.broadcast %cst_127 : f32 to vector<8x32xf32>
    %339 = arith.addf %338, %337 : vector<8x32xf32>
    %340 = arith.divf %338, %339 : vector<8x32xf32>
    %341 = arith.mulf %332, %314 : vector<8x32xf32>
    %342 = arith.mulf %326, %334 : vector<8x32xf32>
    %343 = arith.addf %341, %342 : vector<8x32xf32>
    %344 = math.tanh %343 : vector<8x32xf32>
    %345 = arith.mulf %340, %344 : vector<8x32xf32>
    %cst_128 = arith.constant 0.000000e+00 : f32
    %346 = vector.broadcast %cst_128 : f32 to vector<8x32xf32>
    %347 = arith.maximumf %345, %346 : vector<8x32xf32>
    %348 = arith.index_cast %c0_i32_119 : i32 to index
    %c0_129 = arith.constant 0 : index
    %c0_130 = arith.constant 0 : index
    %349 = vector.load %arg9[%348, %c0_129, %c0_130] : memref<8x8x32xf32, #tpu.memory_space<vmem>>, vector<1x8x32xf32>
    %350 = vector.shape_cast %349 : vector<1x8x32xf32> to vector<8x32xf32>
    %351 = vector.shape_cast %347 : vector<8x32xf32> to vector<1x8x32xf32>
    tpu.vector_store %arg9[%348, %c0_129, %c0_130], %351 {strides = array<i32>} : memref<8x8x32xf32, #tpu.memory_space<vmem>>, vector<1x8x32xf32>,
    %c1_i32_131 = arith.constant 1 : i32
    %c0_132 = arith.constant 0 : index
    %c0_133 = arith.constant 0 : index
    %352 = vector.load %arg7[%c0_132, %c0_133] : memref<32x128xf32, #tpu.memory_space<vmem>>, vector<32x128xf32>
    %cst_134 = arith.constant dense<0.000000e+00> : vector<8x128xf32>
    %353 = tpu.matmul %345, %352, %cst_134 {dimension_numbers = #tpu.dot_dimension_numbers<[1], [0], [0], [1], [0, 0, 1, 1], [], []>} : vector<8x32xf32>, vector<32x128xf32>, vector<8x128xf32> -> vector<8x128xf32>
    %354 = arith.index_cast %c1_i32_131 : i32 to index
    %c0_135 = arith.constant 0 : index
    %c0_136 = arith.constant 0 : index
    %355 = vector.load %arg10[%354, %c0_135, %c0_136] : memref<8x8x128xf32, #tpu.memory_space<vmem>>, vector<1x8x128xf32>
    %356 = vector.shape_cast %355 : vector<1x8x128xf32> to vector<8x128xf32>
    %357 = arith.addf %353, %356 : vector<8x128xf32>
    %358 = vector.extract_strided_slice %357 {offsets = [0, 0], sizes = [8, 32], strides = [1, 1]} : vector<8x128xf32> to vector<8x32xf32>
    %359 = arith.negf %358 : vector<8x32xf32>
    %360 = math.exp %359 : vector<8x32xf32>
    %cst_137 = arith.constant 1.000000e+00 : f32
    %361 = vector.broadcast %cst_137 : f32 to vector<8x32xf32>
    %362 = arith.addf %361, %360 : vector<8x32xf32>
    %363 = arith.divf %361, %362 : vector<8x32xf32>
    %364 = vector.extract_strided_slice %357 {offsets = [0, 32], sizes = [8, 32], strides = [1, 1]} : vector<8x128xf32> to vector<8x32xf32>
    %365 = arith.negf %364 : vector<8x32xf32>
    %366 = math.exp %365 : vector<8x32xf32>
    %cst_138 = arith.constant 1.000000e+00 : f32
    %367 = vector.broadcast %cst_138 : f32 to vector<8x32xf32>
    %368 = arith.addf %367, %366 : vector<8x32xf32>
    %369 = arith.divf %367, %368 : vector<8x32xf32>
    %370 = vector.extract_strided_slice %357 {offsets = [0, 64], sizes = [8, 32], strides = [1, 1]} : vector<8x128xf32> to vector<8x32xf32>
    %371 = math.tanh %370 : vector<8x32xf32>
    %372 = vector.extract_strided_slice %357 {offsets = [0, 96], sizes = [8, 32], strides = [1, 1]} : vector<8x128xf32> to vector<8x32xf32>
    %373 = arith.negf %372 : vector<8x32xf32>
    %374 = math.exp %373 : vector<8x32xf32>
    %cst_139 = arith.constant 1.000000e+00 : f32
    %375 = vector.broadcast %cst_139 : f32 to vector<8x32xf32>
    %376 = arith.addf %375, %374 : vector<8x32xf32>
    %377 = arith.divf %375, %376 : vector<8x32xf32>
    %378 = arith.mulf %369, %343 : vector<8x32xf32>
    %379 = arith.mulf %363, %371 : vector<8x32xf32>
    %380 = arith.addf %378, %379 : vector<8x32xf32>
    %381 = math.tanh %380 : vector<8x32xf32>
    %382 = arith.mulf %377, %381 : vector<8x32xf32>
    %cst_140 = arith.constant 0.000000e+00 : f32
    %383 = vector.broadcast %cst_140 : f32 to vector<8x32xf32>
    %384 = arith.maximumf %382, %383 : vector<8x32xf32>
    %385 = arith.index_cast %c1_i32_131 : i32 to index
    %c0_141 = arith.constant 0 : index
    %c0_142 = arith.constant 0 : index
    %386 = vector.load %arg9[%385, %c0_141, %c0_142] : memref<8x8x32xf32, #tpu.memory_space<vmem>>, vector<1x8x32xf32>
    %387 = vector.shape_cast %386 : vector<1x8x32xf32> to vector<8x32xf32>
    %388 = vector.shape_cast %384 : vector<8x32xf32> to vector<1x8x32xf32>
    tpu.vector_store %arg9[%385, %c0_141, %c0_142], %388 {strides = array<i32>} : memref<8x8x32xf32, #tpu.memory_space<vmem>>, vector<1x8x32xf32>,
    %c2_i32_143 = arith.constant 2 : i32
    %c0_144 = arith.constant 0 : index
    %c0_145 = arith.constant 0 : index
    %389 = vector.load %arg7[%c0_144, %c0_145] : memref<32x128xf32, #tpu.memory_space<vmem>>, vector<32x128xf32>
    %cst_146 = arith.constant dense<0.000000e+00> : vector<8x128xf32>
    %390 = tpu.matmul %382, %389, %cst_146 {dimension_numbers = #tpu.dot_dimension_numbers<[1], [0], [0], [1], [0, 0, 1, 1], [], []>} : vector<8x32xf32>, vector<32x128xf32>, vector<8x128xf32> -> vector<8x128xf32>
    %391 = arith.index_cast %c2_i32_143 : i32 to index
    %c0_147 = arith.constant 0 : index
    %c0_148 = arith.constant 0 : index
    %392 = vector.load %arg10[%391, %c0_147, %c0_148] : memref<8x8x128xf32, #tpu.memory_space<vmem>>, vector<1x8x128xf32>
    %393 = vector.shape_cast %392 : vector<1x8x128xf32> to vector<8x128xf32>
    %394 = arith.addf %390, %393 : vector<8x128xf32>
    %395 = vector.extract_strided_slice %394 {offsets = [0, 0], sizes = [8, 32], strides = [1, 1]} : vector<8x128xf32> to vector<8x32xf32>
    %396 = arith.negf %395 : vector<8x32xf32>
    %397 = math.exp %396 : vector<8x32xf32>
    %cst_149 = arith.constant 1.000000e+00 : f32
    %398 = vector.broadcast %cst_149 : f32 to vector<8x32xf32>
    %399 = arith.addf %398, %397 : vector<8x32xf32>
    %400 = arith.divf %398, %399 : vector<8x32xf32>
    %401 = vector.extract_strided_slice %394 {offsets = [0, 32], sizes = [8, 32], strides = [1, 1]} : vector<8x128xf32> to vector<8x32xf32>
    %402 = arith.negf %401 : vector<8x32xf32>
    %403 = math.exp %402 : vector<8x32xf32>
    %cst_150 = arith.constant 1.000000e+00 : f32
    %404 = vector.broadcast %cst_150 : f32 to vector<8x32xf32>
    %405 = arith.addf %404, %403 : vector<8x32xf32>
    %406 = arith.divf %404, %405 : vector<8x32xf32>
    %407 = vector.extract_strided_slice %394 {offsets = [0, 64], sizes = [8, 32], strides = [1, 1]} : vector<8x128xf32> to vector<8x32xf32>
    %408 = math.tanh %407 : vector<8x32xf32>
    %409 = vector.extract_strided_slice %394 {offsets = [0, 96], sizes = [8, 32], strides = [1, 1]} : vector<8x128xf32> to vector<8x32xf32>
    %410 = arith.negf %409 : vector<8x32xf32>
    %411 = math.exp %410 : vector<8x32xf32>
    %cst_151 = arith.constant 1.000000e+00 : f32
    %412 = vector.broadcast %cst_151 : f32 to vector<8x32xf32>
    %413 = arith.addf %412, %411 : vector<8x32xf32>
    %414 = arith.divf %412, %413 : vector<8x32xf32>
    %415 = arith.mulf %406, %380 : vector<8x32xf32>
    %416 = arith.mulf %400, %408 : vector<8x32xf32>
    %417 = arith.addf %415, %416 : vector<8x32xf32>
    %418 = math.tanh %417 : vector<8x32xf32>
    %419 = arith.mulf %414, %418 : vector<8x32xf32>
    %cst_152 = arith.constant 0.000000e+00 : f32
    %420 = vector.broadcast %cst_152 : f32 to vector<8x32xf32>
    %421 = arith.maximumf %419, %420 : vector<8x32xf32>
    %422 = arith.index_cast %c2_i32_143 : i32 to index
    %c0_153 = arith.constant 0 : index
    %c0_154 = arith.constant 0 : index
    %423 = vector.load %arg9[%422, %c0_153, %c0_154] : memref<8x8x32xf32, #tpu.memory_space<vmem>>, vector<1x8x32xf32>
    %424 = vector.shape_cast %423 : vector<1x8x32xf32> to vector<8x32xf32>
    %425 = vector.shape_cast %421 : vector<8x32xf32> to vector<1x8x32xf32>
    tpu.vector_store %arg9[%422, %c0_153, %c0_154], %425 {strides = array<i32>} : memref<8x8x32xf32, #tpu.memory_space<vmem>>, vector<1x8x32xf32>,
    %c3_i32_155 = arith.constant 3 : i32
    %c0_156 = arith.constant 0 : index
    %c0_157 = arith.constant 0 : index
    %426 = vector.load %arg7[%c0_156, %c0_157] : memref<32x128xf32, #tpu.memory_space<vmem>>, vector<32x128xf32>
    %cst_158 = arith.constant dense<0.000000e+00> : vector<8x128xf32>
    %427 = tpu.matmul %419, %426, %cst_158 {dimension_numbers = #tpu.dot_dimension_numbers<[1], [0], [0], [1], [0, 0, 1, 1], [], []>} : vector<8x32xf32>, vector<32x128xf32>, vector<8x128xf32> -> vector<8x128xf32>
    %428 = arith.index_cast %c3_i32_155 : i32 to index
    %c0_159 = arith.constant 0 : index
    %c0_160 = arith.constant 0 : index
    %429 = vector.load %arg10[%428, %c0_159, %c0_160] : memref<8x8x128xf32, #tpu.memory_space<vmem>>, vector<1x8x128xf32>
    %430 = vector.shape_cast %429 : vector<1x8x128xf32> to vector<8x128xf32>
    %431 = arith.addf %427, %430 : vector<8x128xf32>
    %432 = vector.extract_strided_slice %431 {offsets = [0, 0], sizes = [8, 32], strides = [1, 1]} : vector<8x128xf32> to vector<8x32xf32>
    %433 = arith.negf %432 : vector<8x32xf32>
    %434 = math.exp %433 : vector<8x32xf32>
    %cst_161 = arith.constant 1.000000e+00 : f32
    %435 = vector.broadcast %cst_161 : f32 to vector<8x32xf32>
    %436 = arith.addf %435, %434 : vector<8x32xf32>
    %437 = arith.divf %435, %436 : vector<8x32xf32>
    %438 = vector.extract_strided_slice %431 {offsets = [0, 32], sizes = [8, 32], strides = [1, 1]} : vector<8x128xf32> to vector<8x32xf32>
    %439 = arith.negf %438 : vector<8x32xf32>
    %440 = math.exp %439 : vector<8x32xf32>
    %cst_162 = arith.constant 1.000000e+00 : f32
    %441 = vector.broadcast %cst_162 : f32 to vector<8x32xf32>
    %442 = arith.addf %441, %440 : vector<8x32xf32>
    %443 = arith.divf %441, %442 : vector<8x32xf32>
    %444 = vector.extract_strided_slice %431 {offsets = [0, 64], sizes = [8, 32], strides = [1, 1]} : vector<8x128xf32> to vector<8x32xf32>
    %445 = math.tanh %444 : vector<8x32xf32>
    %446 = vector.extract_strided_slice %431 {offsets = [0, 96], sizes = [8, 32], strides = [1, 1]} : vector<8x128xf32> to vector<8x32xf32>
    %447 = arith.negf %446 : vector<8x32xf32>
    %448 = math.exp %447 : vector<8x32xf32>
    %cst_163 = arith.constant 1.000000e+00 : f32
    %449 = vector.broadcast %cst_163 : f32 to vector<8x32xf32>
    %450 = arith.addf %449, %448 : vector<8x32xf32>
    %451 = arith.divf %449, %450 : vector<8x32xf32>
    %452 = arith.mulf %443, %417 : vector<8x32xf32>
    %453 = arith.mulf %437, %445 : vector<8x32xf32>
    %454 = arith.addf %452, %453 : vector<8x32xf32>
    %455 = math.tanh %454 : vector<8x32xf32>
    %456 = arith.mulf %451, %455 : vector<8x32xf32>
    %cst_164 = arith.constant 0.000000e+00 : f32
    %457 = vector.broadcast %cst_164 : f32 to vector<8x32xf32>
    %458 = arith.maximumf %456, %457 : vector<8x32xf32>
    %459 = arith.index_cast %c3_i32_155 : i32 to index
    %c0_165 = arith.constant 0 : index
    %c0_166 = arith.constant 0 : index
    %460 = vector.load %arg9[%459, %c0_165, %c0_166] : memref<8x8x32xf32, #tpu.memory_space<vmem>>, vector<1x8x32xf32>
    %461 = vector.shape_cast %460 : vector<1x8x32xf32> to vector<8x32xf32>
    %462 = vector.shape_cast %458 : vector<8x32xf32> to vector<1x8x32xf32>
    tpu.vector_store %arg9[%459, %c0_165, %c0_166], %462 {strides = array<i32>} : memref<8x8x32xf32, #tpu.memory_space<vmem>>, vector<1x8x32xf32>,
    %c4_i32_167 = arith.constant 4 : i32
    %c0_168 = arith.constant 0 : index
    %c0_169 = arith.constant 0 : index
    %463 = vector.load %arg7[%c0_168, %c0_169] : memref<32x128xf32, #tpu.memory_space<vmem>>, vector<32x128xf32>
    %cst_170 = arith.constant dense<0.000000e+00> : vector<8x128xf32>
    %464 = tpu.matmul %456, %463, %cst_170 {dimension_numbers = #tpu.dot_dimension_numbers<[1], [0], [0], [1], [0, 0, 1, 1], [], []>} : vector<8x32xf32>, vector<32x128xf32>, vector<8x128xf32> -> vector<8x128xf32>
    %465 = arith.index_cast %c4_i32_167 : i32 to index
    %c0_171 = arith.constant 0 : index
    %c0_172 = arith.constant 0 : index
    %466 = vector.load %arg10[%465, %c0_171, %c0_172] : memref<8x8x128xf32, #tpu.memory_space<vmem>>, vector<1x8x128xf32>
    %467 = vector.shape_cast %466 : vector<1x8x128xf32> to vector<8x128xf32>
    %468 = arith.addf %464, %467 : vector<8x128xf32>
    %469 = vector.extract_strided_slice %468 {offsets = [0, 0], sizes = [8, 32], strides = [1, 1]} : vector<8x128xf32> to vector<8x32xf32>
    %470 = arith.negf %469 : vector<8x32xf32>
    %471 = math.exp %470 : vector<8x32xf32>
    %cst_173 = arith.constant 1.000000e+00 : f32
    %472 = vector.broadcast %cst_173 : f32 to vector<8x32xf32>
    %473 = arith.addf %472, %471 : vector<8x32xf32>
    %474 = arith.divf %472, %473 : vector<8x32xf32>
    %475 = vector.extract_strided_slice %468 {offsets = [0, 32], sizes = [8, 32], strides = [1, 1]} : vector<8x128xf32> to vector<8x32xf32>
    %476 = arith.negf %475 : vector<8x32xf32>
    %477 = math.exp %476 : vector<8x32xf32>
    %cst_174 = arith.constant 1.000000e+00 : f32
    %478 = vector.broadcast %cst_174 : f32 to vector<8x32xf32>
    %479 = arith.addf %478, %477 : vector<8x32xf32>
    %480 = arith.divf %478, %479 : vector<8x32xf32>
    %481 = vector.extract_strided_slice %468 {offsets = [0, 64], sizes = [8, 32], strides = [1, 1]} : vector<8x128xf32> to vector<8x32xf32>
    %482 = math.tanh %481 : vector<8x32xf32>
    %483 = vector.extract_strided_slice %468 {offsets = [0, 96], sizes = [8, 32], strides = [1, 1]} : vector<8x128xf32> to vector<8x32xf32>
    %484 = arith.negf %483 : vector<8x32xf32>
    %485 = math.exp %484 : vector<8x32xf32>
    %cst_175 = arith.constant 1.000000e+00 : f32
    %486 = vector.broadcast %cst_175 : f32 to vector<8x32xf32>
    %487 = arith.addf %486, %485 : vector<8x32xf32>
    %488 = arith.divf %486, %487 : vector<8x32xf32>
    %489 = arith.mulf %480, %454 : vector<8x32xf32>
    %490 = arith.mulf %474, %482 : vector<8x32xf32>
    %491 = arith.addf %489, %490 : vector<8x32xf32>
    %492 = math.tanh %491 : vector<8x32xf32>
    %493 = arith.mulf %488, %492 : vector<8x32xf32>
    %cst_176 = arith.constant 0.000000e+00 : f32
    %494 = vector.broadcast %cst_176 : f32 to vector<8x32xf32>
    %495 = arith.maximumf %493, %494 : vector<8x32xf32>
    %496 = arith.index_cast %c4_i32_167 : i32 to index
    %c0_177 = arith.constant 0 : index
    %c0_178 = arith.constant 0 : index
    %497 = vector.load %arg9[%496, %c0_177, %c0_178] : memref<8x8x32xf32, #tpu.memory_space<vmem>>, vector<1x8x32xf32>
    %498 = vector.shape_cast %497 : vector<1x8x32xf32> to vector<8x32xf32>
    %499 = vector.shape_cast %495 : vector<8x32xf32> to vector<1x8x32xf32>
    tpu.vector_store %arg9[%496, %c0_177, %c0_178], %499 {strides = array<i32>} : memref<8x8x32xf32, #tpu.memory_space<vmem>>, vector<1x8x32xf32>,
    %c5_i32_179 = arith.constant 5 : i32
    %c0_180 = arith.constant 0 : index
    %c0_181 = arith.constant 0 : index
    %500 = vector.load %arg7[%c0_180, %c0_181] : memref<32x128xf32, #tpu.memory_space<vmem>>, vector<32x128xf32>
    %cst_182 = arith.constant dense<0.000000e+00> : vector<8x128xf32>
    %501 = tpu.matmul %493, %500, %cst_182 {dimension_numbers = #tpu.dot_dimension_numbers<[1], [0], [0], [1], [0, 0, 1, 1], [], []>} : vector<8x32xf32>, vector<32x128xf32>, vector<8x128xf32> -> vector<8x128xf32>
    %502 = arith.index_cast %c5_i32_179 : i32 to index
    %c0_183 = arith.constant 0 : index
    %c0_184 = arith.constant 0 : index
    %503 = vector.load %arg10[%502, %c0_183, %c0_184] : memref<8x8x128xf32, #tpu.memory_space<vmem>>, vector<1x8x128xf32>
    %504 = vector.shape_cast %503 : vector<1x8x128xf32> to vector<8x128xf32>
    %505 = arith.addf %501, %504 : vector<8x128xf32>
    %506 = vector.extract_strided_slice %505 {offsets = [0, 0], sizes = [8, 32], strides = [1, 1]} : vector<8x128xf32> to vector<8x32xf32>
    %507 = arith.negf %506 : vector<8x32xf32>
    %508 = math.exp %507 : vector<8x32xf32>
    %cst_185 = arith.constant 1.000000e+00 : f32
    %509 = vector.broadcast %cst_185 : f32 to vector<8x32xf32>
    %510 = arith.addf %509, %508 : vector<8x32xf32>
    %511 = arith.divf %509, %510 : vector<8x32xf32>
    %512 = vector.extract_strided_slice %505 {offsets = [0, 32], sizes = [8, 32], strides = [1, 1]} : vector<8x128xf32> to vector<8x32xf32>
    %513 = arith.negf %512 : vector<8x32xf32>
    %514 = math.exp %513 : vector<8x32xf32>
    %cst_186 = arith.constant 1.000000e+00 : f32
    %515 = vector.broadcast %cst_186 : f32 to vector<8x32xf32>
    %516 = arith.addf %515, %514 : vector<8x32xf32>
    %517 = arith.divf %515, %516 : vector<8x32xf32>
    %518 = vector.extract_strided_slice %505 {offsets = [0, 64], sizes = [8, 32], strides = [1, 1]} : vector<8x128xf32> to vector<8x32xf32>
    %519 = math.tanh %518 : vector<8x32xf32>
    %520 = vector.extract_strided_slice %505 {offsets = [0, 96], sizes = [8, 32], strides = [1, 1]} : vector<8x128xf32> to vector<8x32xf32>
    %521 = arith.negf %520 : vector<8x32xf32>
    %522 = math.exp %521 : vector<8x32xf32>
    %cst_187 = arith.constant 1.000000e+00 : f32
    %523 = vector.broadcast %cst_187 : f32 to vector<8x32xf32>
    %524 = arith.addf %523, %522 : vector<8x32xf32>
    %525 = arith.divf %523, %524 : vector<8x32xf32>
    %526 = arith.mulf %517, %491 : vector<8x32xf32>
    %527 = arith.mulf %511, %519 : vector<8x32xf32>
    %528 = arith.addf %526, %527 : vector<8x32xf32>
    %529 = math.tanh %528 : vector<8x32xf32>
    %530 = arith.mulf %525, %529 : vector<8x32xf32>
    %cst_188 = arith.constant 0.000000e+00 : f32
    %531 = vector.broadcast %cst_188 : f32 to vector<8x32xf32>
    %532 = arith.maximumf %530, %531 : vector<8x32xf32>
    %533 = arith.index_cast %c5_i32_179 : i32 to index
    %c0_189 = arith.constant 0 : index
    %c0_190 = arith.constant 0 : index
    %534 = vector.load %arg9[%533, %c0_189, %c0_190] : memref<8x8x32xf32, #tpu.memory_space<vmem>>, vector<1x8x32xf32>
    %535 = vector.shape_cast %534 : vector<1x8x32xf32> to vector<8x32xf32>
    %536 = vector.shape_cast %532 : vector<8x32xf32> to vector<1x8x32xf32>
    tpu.vector_store %arg9[%533, %c0_189, %c0_190], %536 {strides = array<i32>} : memref<8x8x32xf32, #tpu.memory_space<vmem>>, vector<1x8x32xf32>,
    %c6_i32_191 = arith.constant 6 : i32
    %c0_192 = arith.constant 0 : index
    %c0_193 = arith.constant 0 : index
    %537 = vector.load %arg7[%c0_192, %c0_193] : memref<32x128xf32, #tpu.memory_space<vmem>>, vector<32x128xf32>
    %cst_194 = arith.constant dense<0.000000e+00> : vector<8x128xf32>
    %538 = tpu.matmul %530, %537, %cst_194 {dimension_numbers = #tpu.dot_dimension_numbers<[1], [0], [0], [1], [0, 0, 1, 1], [], []>} : vector<8x32xf32>, vector<32x128xf32>, vector<8x128xf32> -> vector<8x128xf32>
    %539 = arith.index_cast %c6_i32_191 : i32 to index
    %c0_195 = arith.constant 0 : index
    %c0_196 = arith.constant 0 : index
    %540 = vector.load %arg10[%539, %c0_195, %c0_196] : memref<8x8x128xf32, #tpu.memory_space<vmem>>, vector<1x8x128xf32>
    %541 = vector.shape_cast %540 : vector<1x8x128xf32> to vector<8x128xf32>
    %542 = arith.addf %538, %541 : vector<8x128xf32>
    %543 = vector.extract_strided_slice %542 {offsets = [0, 0], sizes = [8, 32], strides = [1, 1]} : vector<8x128xf32> to vector<8x32xf32>
    %544 = arith.negf %543 : vector<8x32xf32>
    %545 = math.exp %544 : vector<8x32xf32>
    %cst_197 = arith.constant 1.000000e+00 : f32
    %546 = vector.broadcast %cst_197 : f32 to vector<8x32xf32>
    %547 = arith.addf %546, %545 : vector<8x32xf32>
    %548 = arith.divf %546, %547 : vector<8x32xf32>
    %549 = vector.extract_strided_slice %542 {offsets = [0, 32], sizes = [8, 32], strides = [1, 1]} : vector<8x128xf32> to vector<8x32xf32>
    %550 = arith.negf %549 : vector<8x32xf32>
    %551 = math.exp %550 : vector<8x32xf32>
    %cst_198 = arith.constant 1.000000e+00 : f32
    %552 = vector.broadcast %cst_198 : f32 to vector<8x32xf32>
    %553 = arith.addf %552, %551 : vector<8x32xf32>
    %554 = arith.divf %552, %553 : vector<8x32xf32>
    %555 = vector.extract_strided_slice %542 {offsets = [0, 64], sizes = [8, 32], strides = [1, 1]} : vector<8x128xf32> to vector<8x32xf32>
    %556 = math.tanh %555 : vector<8x32xf32>
    %557 = vector.extract_strided_slice %542 {offsets = [0, 96], sizes = [8, 32], strides = [1, 1]} : vector<8x128xf32> to vector<8x32xf32>
    %558 = arith.negf %557 : vector<8x32xf32>
    %559 = math.exp %558 : vector<8x32xf32>
    %cst_199 = arith.constant 1.000000e+00 : f32
    %560 = vector.broadcast %cst_199 : f32 to vector<8x32xf32>
    %561 = arith.addf %560, %559 : vector<8x32xf32>
    %562 = arith.divf %560, %561 : vector<8x32xf32>
    %563 = arith.mulf %554, %528 : vector<8x32xf32>
    %564 = arith.mulf %548, %556 : vector<8x32xf32>
    %565 = arith.addf %563, %564 : vector<8x32xf32>
    %566 = math.tanh %565 : vector<8x32xf32>
    %567 = arith.mulf %562, %566 : vector<8x32xf32>
    %cst_200 = arith.constant 0.000000e+00 : f32
    %568 = vector.broadcast %cst_200 : f32 to vector<8x32xf32>
    %569 = arith.maximumf %567, %568 : vector<8x32xf32>
    %570 = arith.index_cast %c6_i32_191 : i32 to index
    %c0_201 = arith.constant 0 : index
    %c0_202 = arith.constant 0 : index
    %571 = vector.load %arg9[%570, %c0_201, %c0_202] : memref<8x8x32xf32, #tpu.memory_space<vmem>>, vector<1x8x32xf32>
    %572 = vector.shape_cast %571 : vector<1x8x32xf32> to vector<8x32xf32>
    %573 = vector.shape_cast %569 : vector<8x32xf32> to vector<1x8x32xf32>
    tpu.vector_store %arg9[%570, %c0_201, %c0_202], %573 {strides = array<i32>} : memref<8x8x32xf32, #tpu.memory_space<vmem>>, vector<1x8x32xf32>,
    %c7_i32_203 = arith.constant 7 : i32
    %c0_204 = arith.constant 0 : index
    %c0_205 = arith.constant 0 : index
    %574 = vector.load %arg7[%c0_204, %c0_205] : memref<32x128xf32, #tpu.memory_space<vmem>>, vector<32x128xf32>
    %cst_206 = arith.constant dense<0.000000e+00> : vector<8x128xf32>
    %575 = tpu.matmul %567, %574, %cst_206 {dimension_numbers = #tpu.dot_dimension_numbers<[1], [0], [0], [1], [0, 0, 1, 1], [], []>} : vector<8x32xf32>, vector<32x128xf32>, vector<8x128xf32> -> vector<8x128xf32>
    %576 = arith.index_cast %c7_i32_203 : i32 to index
    %c0_207 = arith.constant 0 : index
    %c0_208 = arith.constant 0 : index
    %577 = vector.load %arg10[%576, %c0_207, %c0_208] : memref<8x8x128xf32, #tpu.memory_space<vmem>>, vector<1x8x128xf32>
    %578 = vector.shape_cast %577 : vector<1x8x128xf32> to vector<8x128xf32>
    %579 = arith.addf %575, %578 : vector<8x128xf32>
    %580 = vector.extract_strided_slice %579 {offsets = [0, 0], sizes = [8, 32], strides = [1, 1]} : vector<8x128xf32> to vector<8x32xf32>
    %581 = arith.negf %580 : vector<8x32xf32>
    %582 = math.exp %581 : vector<8x32xf32>
    %cst_209 = arith.constant 1.000000e+00 : f32
    %583 = vector.broadcast %cst_209 : f32 to vector<8x32xf32>
    %584 = arith.addf %583, %582 : vector<8x32xf32>
    %585 = arith.divf %583, %584 : vector<8x32xf32>
    %586 = vector.extract_strided_slice %579 {offsets = [0, 32], sizes = [8, 32], strides = [1, 1]} : vector<8x128xf32> to vector<8x32xf32>
    %587 = arith.negf %586 : vector<8x32xf32>
    %588 = math.exp %587 : vector<8x32xf32>
    %cst_210 = arith.constant 1.000000e+00 : f32
    %589 = vector.broadcast %cst_210 : f32 to vector<8x32xf32>
    %590 = arith.addf %589, %588 : vector<8x32xf32>
    %591 = arith.divf %589, %590 : vector<8x32xf32>
    %592 = vector.extract_strided_slice %579 {offsets = [0, 64], sizes = [8, 32], strides = [1, 1]} : vector<8x128xf32> to vector<8x32xf32>
    %593 = math.tanh %592 : vector<8x32xf32>
    %594 = vector.extract_strided_slice %579 {offsets = [0, 96], sizes = [8, 32], strides = [1, 1]} : vector<8x128xf32> to vector<8x32xf32>
    %595 = arith.negf %594 : vector<8x32xf32>
    %596 = math.exp %595 : vector<8x32xf32>
    %cst_211 = arith.constant 1.000000e+00 : f32
    %597 = vector.broadcast %cst_211 : f32 to vector<8x32xf32>
    %598 = arith.addf %597, %596 : vector<8x32xf32>
    %599 = arith.divf %597, %598 : vector<8x32xf32>
    %600 = arith.mulf %591, %565 : vector<8x32xf32>
    %601 = arith.mulf %585, %593 : vector<8x32xf32>
    %602 = arith.addf %600, %601 : vector<8x32xf32>
    %603 = math.tanh %602 : vector<8x32xf32>
    %604 = arith.mulf %599, %603 : vector<8x32xf32>
    %cst_212 = arith.constant 0.000000e+00 : f32
    %605 = vector.broadcast %cst_212 : f32 to vector<8x32xf32>
    %606 = arith.maximumf %604, %605 : vector<8x32xf32>
    %607 = arith.index_cast %c7_i32_203 : i32 to index
    %c0_213 = arith.constant 0 : index
    %c0_214 = arith.constant 0 : index
    %608 = vector.load %arg9[%607, %c0_213, %c0_214] : memref<8x8x32xf32, #tpu.memory_space<vmem>>, vector<1x8x32xf32>
    %609 = vector.shape_cast %608 : vector<1x8x32xf32> to vector<8x32xf32>
    %610 = vector.shape_cast %606 : vector<8x32xf32> to vector<1x8x32xf32>
    tpu.vector_store %arg9[%607, %c0_213, %c0_214], %610 {strides = array<i32>} : memref<8x8x32xf32, #tpu.memory_space<vmem>>, vector<1x8x32xf32>,
    %c8_i32_215 = arith.constant 8 : i32
    %c1_216 = arith.constant 1 : index
    %c0_217 = arith.constant 0 : index
    %c0_218 = arith.constant 0 : index
    %611 = vector.load %arg12[%c1_216, %c0_217, %c0_218] : memref<2x8x32xf32, #tpu.memory_space<vmem>>, vector<1x8x32xf32>
    %612 = vector.shape_cast %611 : vector<1x8x32xf32> to vector<8x32xf32>
    %613 = vector.shape_cast %604 : vector<8x32xf32> to vector<1x8x32xf32>
    tpu.vector_store %arg12[%c1_216, %c0_217, %c0_218], %613 {strides = array<i32>} : memref<2x8x32xf32, #tpu.memory_space<vmem>>, vector<1x8x32xf32>,
    %c1_219 = arith.constant 1 : index
    %c0_220 = arith.constant 0 : index
    %c0_221 = arith.constant 0 : index
    %614 = vector.load %arg13[%c1_219, %c0_220, %c0_221] : memref<2x8x32xf32, #tpu.memory_space<vmem>>, vector<1x8x32xf32>
    %615 = vector.shape_cast %614 : vector<1x8x32xf32> to vector<8x32xf32>
    %616 = vector.shape_cast %602 : vector<8x32xf32> to vector<1x8x32xf32>
    tpu.vector_store %arg13[%c1_219, %c0_220, %c0_221], %616 {strides = array<i32>} : memref<2x8x32xf32, #tpu.memory_space<vmem>>, vector<1x8x32xf32>,
    return
  }
  func.func @transform_0(%arg0: i32, %arg1: i32) -> (i32, i32, i32) {
    %c0_i32 = arith.constant 0 : i32
    %c0_i32_0 = arith.constant 0 : i32
    return %arg1, %arg0, %c0_i32 : i32, i32, i32
  }
  func.func @transform_1(%arg0: i32, %arg1: i32) -> (i32, i32) {
    %c0_i32 = arith.constant 0 : i32
    %c0_i32_0 = arith.constant 0 : i32
    %c0_i32_1 = arith.constant 0 : i32
    return %c0_i32, %c0_i32_0 : i32, i32
  }
  func.func @transform_2(%arg0: i32, %arg1: i32) -> (i32, i32) {
    %c0_i32 = arith.constant 0 : i32
    %c0_i32_0 = arith.constant 0 : i32
    %c0_i32_1 = arith.constant 0 : i32
    return %c0_i32, %c0_i32_0 : i32, i32
  }
  func.func @transform_3(%arg0: i32, %arg1: i32) -> (i32, i32) {
    %c0_i32 = arith.constant 0 : i32
    %c0_i32_0 = arith.constant 0 : i32
    %c0_i32_1 = arith.constant 0 : i32
    return %c0_i32, %c0_i32_0 : i32, i32
  }
  func.func @transform_4(%arg0: i32, %arg1: i32) -> (i32, i32) {
    %c0_i32 = arith.constant 0 : i32
    %c0_i32_0 = arith.constant 0 : i32
    %c0_i32_1 = arith.constant 0 : i32
    return %c0_i32, %c0_i32_0 : i32, i32
  }
  func.func @transform_5(%arg0: i32, %arg1: i32) -> (i32, i32) {
    %c0_i32 = arith.constant 0 : i32
    %c0_i32_0 = arith.constant 0 : i32
    %c0_i32_1 = arith.constant 0 : i32
    return %c0_i32, %c0_i32_0 : i32, i32
  }
  func.func @transform_6(%arg0: i32, %arg1: i32) -> (i32, i32) {
    %c0_i32 = arith.constant 0 : i32
    %c0_i32_0 = arith.constant 0 : i32
    %c0_i32_1 = arith.constant 0 : i32
    return %c0_i32, %c0_i32_0 : i32, i32
  }
  func.func @transform_7(%arg0: i32, %arg1: i32) -> (i32, i32, i32) {
    %c0_i32 = arith.constant 0 : i32
    %c0_i32_0 = arith.constant 0 : i32
    return %arg1, %arg0, %c0_i32 : i32, i32, i32
  }
}

</mosaic_0001>

<bundles_post_ra>
// kernel: tpu_custom_call.1
= control target key start
LH: loop header
LB: loop body
LE: loop exit
PB: predicated region body
PF: predicated region fallthrough
CT: control target
= control target key end

     0   :  { %12 = vsyncpa [#allocation7], 0  ;;  %s3454_s0 = inlined_call_operand.hbm [shape: f32[8,8,16], index: 0, kind: input, shape index: {}]   ;;  %s3455_s1 = inlined_call_operand.hbm [shape: f32[16,128], index: 1, kind: input, shape index: {}]   ;;  %s3456_s2 = inlined_call_operand.hbm [shape: f32[32,128], index: 2, kind: input, shape index: {}]   ;;  %s3457_s3 = inlined_call_operand.vmem [shape: f32[1,128], index: 3, kind: input, shape index: {}]   ;;  %s3458_s4 = inlined_call_operand.hbm [shape: f32[32,128], index: 4, kind: input, shape index: {}]   ;;  %s3459_s5 = inlined_call_operand.hbm [shape: f32[32,128], index: 5, kind: input, shape index: {}]   ;;  %s3460_s6 = inlined_call_operand.vmem [shape: f32[1,128], index: 6, kind: input, shape index: {}]   ;;  %s3461_s7 = inlined_call_operand.hbm [shape: f32[8,8,32], index: 7, kind: output, shape index: {}]  }
   0x1   :  { %13 = vsyncpa [#allocation10], 0 }
   0x2   :  { %14 = vsyncpa [#allocation13], 0 }
   0x3   :  { %15 = vsyncpa [#allocation8], 0  ;;  %s2967_s24 = smov [#allocation9]   ;;  %s2968_s26 = smov [#allocation12]  }
   0x4   :  { %s33_s25 = sshll.u32 %s2967_s24, 4  ;;  %s59_s27 = sshll.u32 %s2968_s26, 4  ;;  %s34_s25 = int_to_ptr.vmem [resolvable:$true] %s33_s25  ;;  %s3021_s27 = int_to_ptr.vmem [resolvable:$true] %s59_s27 }
   0x5   :  { %s2827_s30 = scalar_lea.hbm %s3455_s1, 256 }
   0x6   :  { %p2828_p0 = scmp.ne.s32.totalorder %s3455_s1, %s2827_s30  ;;  %p2831_p1 = scmp.lt.u32.totalorder %s2827_s30, %s3455_s1 }
   0x8   :  { %p2833_p2 = pnand %p2831_p1, %p2828_p0 }
   0xa   :  { %2836 = shalt.err (!%p2833_p2)
}
   0xb   :  { %s2837_s12 = scalar_lea.vmem %s34_s25, 256  ;;  %p2842_p4 = scmp.lt.s32.totalorder %s34_s25, %s34_s25 }
   0xc   :  { %p2838_p3 = scmp.ne.s32.totalorder %s34_s25, %s2837_s12  ;;  %p2843_p5 = scmp.lt.s32.totalorder %s2837_s12, %s2837_s12 }
   0xe   :  { %p2844_p6 = por %p2843_p5, %p2842_p4 }
  0x10   :  { %p2845_p7 = pnand %p2844_p6, %p2838_p3 }
  0x12   :  { %2848 = shalt.err (!%p2845_p7)
}
  0x13   :  { %s2969_s13 = smov 128   ;;  %s2970_s14 = smov 8  }
  0x14   :  { %39 = dma.hbm_to_vmem [thread:$0]  %s3455_s1, 256, %s34_s25, [#allocation10], %s2969_s13, %s2969_s13, %s2970_s14  }
  0x15   :  { %s2849_s19 = scalar_lea.hbm %s3458_s4, 512 }
  0x16   :  { %p2850_p8 = scmp.ne.s32.totalorder %s3458_s4, %s2849_s19  ;;  %p2853_p9 = scmp.lt.u32.totalorder %s2849_s19, %s3458_s4 }
  0x18   :  { %p2855_p10 = pnand %p2853_p9, %p2850_p8 }
  0x1a   :  { %2858 = shalt.err (!%p2855_p10)
}
  0x1b   :  { %s2859_s24 = scalar_lea.vmem %s3021_s27, 512  ;;  %p2864_p12 = scmp.lt.s32.totalorder %s3021_s27, %s3021_s27 }
  0x1c   :  { %p2860_p11 = scmp.ne.s32.totalorder %s3021_s27, %s2859_s24  ;;  %p2865_p13 = scmp.lt.s32.totalorder %s2859_s24, %s2859_s24 }
  0x1e   :  { %p2866_p0 = por %p2865_p13, %p2864_p12 }
  0x20   :  { %p2867_p1 = pnand %p2866_p0, %p2860_p11 }
  0x22   :  { %2870 = shalt.err (!%p2867_p1)
}
  0x23   :  { %65 = dma.hbm_to_vmem [thread:$0]  %s3458_s4, 512, %s3021_s27, [#allocation13], %s2969_s13, %s2969_s13, %s2970_s14  }
  0x24   :  { %s2971_s26 = smov [#allocation6]   ;;  %s2972_s29 = smov [#allocation11]  }
  0x25   :  { %s21_s28 = sshll.u32 %s2971_s26, 4  ;;  %s45_s30 = sshll.u32 %s2972_s29, 4  ;;  %s22_s28 = int_to_ptr.vmem [resolvable:$true] %s21_s28  ;;  %s3058_s30 = int_to_ptr.vmem [resolvable:$true] %s45_s30 }
  0x26   :  { %s2871_s10 = scalar_lea.hbm %s3454_s0, 1024 }
  0x27   :  { %p2872_p2 = scmp.ne.s32.totalorder %s3454_s0, %s2871_s10  ;;  %p2875_p3 = scmp.lt.u32.totalorder %s2871_s10, %s3454_s0 }
  0x29   :  { %p2877_p4 = pnand %p2875_p3, %p2872_p2 }
  0x2b   :  { %2880 = shalt.err (!%p2877_p4)
}
  0x2c   :  { %s2881_s4 = scalar_lea.vmem %s22_s28, 1024  ;;  %p2886_p6 = scmp.lt.s32.totalorder %s22_s28, %s22_s28 }
  0x2d   :  { %p2882_p5 = scmp.ne.s32.totalorder %s22_s28, %s2881_s4  ;;  %p2887_p7 = scmp.lt.s32.totalorder %s2881_s4, %s2881_s4 }
  0x2f   :  { %p2888_p8 = por %p2887_p7, %p2886_p6 }
  0x31   :  { %p2889_p9 = pnand %p2888_p8, %p2882_p5 }
  0x33   :  { %2892 = shalt.err (!%p2889_p9)
}
  0x34   :  { %27 = dma.hbm_to_vmem [thread:$0]  %s3454_s0, 1024, %s22_s28, [#allocation7], %s2969_s13, %s2969_s13, %s2970_s14  }
  0x35   :  { %s2893_s20 = scalar_lea.hbm %s3456_s2, 512 }
  0x36   :  { %p2894_p10 = scmp.ne.s32.totalorder %s3456_s2, %s2893_s20  ;;  %p2897_p11 = scmp.lt.u32.totalorder %s2893_s20, %s3456_s2 }
  0x38   :  { %p2899_p12 = pnand %p2897_p11, %p2894_p10 }
  0x3a   :  { %2902 = shalt.err (!%p2899_p12)
}
  0x3b   :  { %s2903_s1 = scalar_lea.vmem %s3058_s30, 512  ;;  %p2908_p0 = scmp.lt.s32.totalorder %s3058_s30, %s3058_s30 }
  0x3c   :  { %p2904_p13 = scmp.ne.s32.totalorder %s3058_s30, %s2903_s1  ;;  %p2909_p1 = scmp.lt.s32.totalorder %s2903_s1, %s2903_s1 }
  0x3e   :  { %p2910_p2 = por %p2909_p1, %p2908_p0 }
  0x40   :  { %p2911_p3 = pnand %p2910_p2, %p2904_p13 }
  0x42   :  { %2914 = shalt.err (!%p2911_p3)
}
  0x43   :  { %51 = dma.hbm_to_vmem [thread:$0]  %s3456_s2, 512, %s3058_s30, [#allocation10], %s2969_s13, %s2969_s13, %s2970_s14  }
  0x44   :  { %s2973_s26 = smov [#allocation14]   ;;  %s2915_s9 = scalar_lea.hbm %s3459_s5, 512 }
  0x45   :  { %s71_s28 = sshll.u32 %s2973_s26, 4  ;;  %p2916_p4 = scmp.ne.s32.totalorder %s3459_s5, %s2915_s9  ;;  %s72_s28 = int_to_ptr.vmem [resolvable:$true] %s71_s28 }
  0x46   :  { %p2919_p5 = scmp.lt.u32.totalorder %s2915_s9, %s3459_s5 }
  0x48   :  { %p2921_p6 = pnand %p2919_p5, %p2916_p4 }
  0x4a   :  { %2924 = shalt.err (!%p2921_p6)
}
  0x4b   :  { %s2925_s16 = scalar_lea.vmem %s72_s28, 512  ;;  %p2930_p8 = scmp.lt.s32.totalorder %s72_s28, %s72_s28 }
  0x4c   :  { %p2926_p7 = scmp.ne.s32.totalorder %s72_s28, %s2925_s16  ;;  %p2931_p9 = scmp.lt.s32.totalorder %s2925_s16, %s2925_s16 }
  0x4e   :  { %p2932_p10 = por %p2931_p9, %p2930_p8 }
  0x50   :  { %p2933_p11 = pnand %p2932_p10, %p2926_p7 }
  0x52   :  { %2936 = shalt.err (!%p2933_p11)
}
  0x53   :  { %77 = dma.hbm_to_vmem [thread:$0]  %s3459_s5, 512, %s72_s28, [#allocation13], %s2969_s13, %s2969_s13, %s2970_s14  }
  0x54   :  { %2959 = dma.done.wait [#allocation7], 1024  }
  0x55   :  { %2960 = vsyncadd [#allocation7], 4294966272 }
  0x56   :  { %2961 = dma.done.wait [#allocation10], 768  }
  0x57   :  { %2962 = vsyncadd [#allocation10], 4294966528 }
  0x58   :  { %2963 = dma.done.wait [#allocation13], 1024  }
  0x59   :  { %2964 = vsyncadd [#allocation13], 4294966272  ;;  %v2974_v0 = vmov 0.0|0.0   ;;  %vm2975_vm0 = vmmov 0   ;;  %v2976_v1 = vmov 0.0   ;;  %vm99_vm1 = vcmask 261120  }
  0x5a   :  { %2581 = vmatprep.subr.bf16.mxu1 %v2974_v0  ;;  %2389 = vmatprep.mubr.msk.f32.mxu1 %vm2975_vm0, %v2976_v1  ;;  %100 = vst.msk [vmem:[#allocation4] sm:$0xff] %vm99_vm1, %v2976_v1  ;;  %101 = vst.msk [vmem:[#allocation4 + $0x8] sm:$0xff] %vm99_vm1, %v2976_v1  ;;  %vm121_vm2 = vcmask 130048   ;;  %v112_v2 = vld [vmem:[#allocation9] sm:$0xff]  ;;  %v113_v3 = vld [vmem:[#allocation9 + $0x8] sm:$0xff]  ;;  %s2977_s27 = smov 64  }
  0x5b   :  { %102 = vst.msk [vmem:[#allocation5] sm:$0xff] %vm99_vm1, %v2976_v1  ;;  %103 = vst.msk [vmem:[#allocation5 + $0x8] sm:$0xff] %vm99_vm1, %v2976_v1  ;;  %v261_v4 = vld [vmem:[#allocation11] sm:$0xff]  ;;  %v2577_v5 = vpack.c.bf16 %v113_v3, %v112_v2  ;;  %v262_v6 = vld [vmem:[#allocation11 + $0x8] sm:$0xff]  ;;  %s2978_s17 = smov 32   ;;  %s2980_s19 = smov [#allocation15]  }
  0x5c   :  { %v104_v7 = vld [vmem:[#allocation6] sm:$0xff]  ;;  %v3121_v8 = vpack.c.bf16 %v262_v6, %v261_v4  ;;  %v264_v10 = vld [vmem:[#allocation11 + $0x18] sm:$0xff]  ;;  %v106_v51 = vld [vmem:[#allocation6 + $0x10] sm:$0xff]  ;;  %s2199_s20 = sshll.u32 %s2980_s19, 4  ;;  %s2200_s20 = int_to_ptr.vmem [resolvable:$true] %s2199_s20 }
  0x5d   :  { %2369 = vmatprep.mubr.msk.f32.mxu0 %vm121_vm2, %v104_v7  ;;  %v263_v9 = vld [vmem:[#allocation11 + $0x10] sm:$0xff]  ;;  %2578 = vmatprep.subr.bf16.mxu0 %v2577_v5  ;;  %v105_v11 = vld [vmem:[#allocation6 + $0x8] sm:$0xff]  ;;  %v107_v52 = vld [vmem:[#allocation6 + $0x18] sm:$0xff]  ;;  %s2937_s21 = scalar_lea.vmem %s2200_s20, 1024  ;;  %p2942_p13 = scmp.lt.s32.totalorder %s2200_s20, %s2200_s20 }
  0x5e   :  { %2583 = vmatpush3.bf16.msra.mxu1 %v3121_v8  ;;  %2580 = vmatpush3.bf16.msra.mxu0 %v2577_v5  ;;  %v3125_v12 = vpack.c.bf16 %v264_v10, %v263_v9  ;;  %v3146_v14 = vld [vmem:[%s3457_s3] ss:$0 sm:$0xff]  ;;  %v109_v54 = vld [vmem:[#allocation6 + $0x28] sm:$0xff]  ;;  %v110_v55 = vld [vmem:[#allocation6 + $0x30] sm:$0xff]  ;;  %p2938_p12 = scmp.ne.s32.totalorder %s2200_s20, %s2937_s21  ;;  %p2943_p0 = scmp.lt.s32.totalorder %s2937_s21, %s2937_s21 }
  0x5f   :  { %2584 = vmatprep.subr.bf16.mxu1 %v2974_v0  ;;  %2593 = vmatprep.subr.bf16.mxu0 %v2974_v0  ;;  %v108_v53 = vld [vmem:[#allocation6 + $0x20] sm:$0xff]  ;;  %v111_v56 = vld [vmem:[#allocation6 + $0x38] sm:$0xff] }
  0x60   :  { %p2944_p1 = por %p2943_p0, %p2942_p13 }
  0x61   :  { %2370 = vmatmul.mubr.msk.f32.vlgmr.msra.gmra.mrb[0].mxu0 %vm121_vm2, %v105_v11  ;;  %v259_v13 = vld [vmem:[#allocation4] sm:$0xff] }
  0x62   :  { %2586 = vmatpush3.bf16.msra.mxu1 %v3125_v12  ;;  %2595 = vmatpush3.bf16.msra.mxu0 %v3121_v8  ;;  %v260_v22 = vld [vmem:[#allocation5] sm:$0xff]  ;;  %p2945_p2 = pnand %p2944_p1, %p2938_p12 }
  0x63   :  { %2587 = vmatprep.subr.bf16.mxu1 %v2974_v0  ;;  %2596 = vmatprep.subr.bf16.mxu0 %v2974_v0 }
  0x64   :  { %2372 = vmatprep.mubr.msk.f32.mxu0 %vm121_vm2, %v106_v51 }
  0x65   :  { %2390 = vmatmul.mubr.msk.f32.vlgmr.msra.gmra.mrb[0].mxu1 %vm99_vm1, %v259_v13  ;;  %2373 = vmatmul.mubr.msk.f32.gmra.mrb[2].mxu0 %vm121_vm2, %v107_v52 }
  0x66   :  { %2589 = vmatpush3.bf16.msra.mxu1 %v3121_v8  ;;  %2400 = vmatprep.mubr.msk.f32.mxu1 %vm2975_vm0, %v2976_v1 }
  0x67   :  { %2590 = vmatprep.subr.bf16.mxu1 %v2974_v0  ;;  %2598 = vmatpush3.bf16.msra.mxu0 %v3125_v12 }
  0x68   :  { %2605 = vmatprep.subr.bf16.mxu0 %v2974_v0  ;;  %2375 = vmatprep.mubr.msk.f32.mxu0 %vm121_vm2, %v108_v53 }
  0x69   :  { %2376 = vmatmul.mubr.msk.f32.gmra.mrb[4].mxu0 %vm121_vm2, %v109_v54 }
  0x6a   :  { %2592 = vmatpush3.bf16.msra.mxu1 %v3125_v12  ;;  %2378 = vmatprep.mubr.msk.f32.mxu0 %vm121_vm2, %v110_v55 }
  0x6b   :  { %2599 = vmatprep.subr.bf16.mxu1 %v2974_v0 }
  0x6d   :  { %2379 = vmatmul.mubr.msk.f32.gmra.mrb[6].mxu0 %vm121_vm2, %v111_v56 }
  0x6e   :  { %2411 = vmatprep.mubr.msk.f32.mxu0 %vm2975_vm0, %v2976_v1 }
 0x134   :  { %v2371_v15 = vpop.f32.mrb[0].mxu0 }
 0x135   :  { %v212_v16 = vpop.f32.mrb[1].mxu0  ;;  %v218_v37 = vadd.f32 %v2371_v15, %v3146_v14 }
 0x136   :  { %v213_v17 = vadd.f32 %v3146_v14, %v212_v16 }
 0x138   :  { %v336_v18 = vpop.f32.mrb[0].mxu1  ;;  %v2374_v60 = vpop.f32.mrb[2].mxu0 }
 0x139   :  { %v337_v19 = vadd.f32 %v336_v18, %v213_v17  ;;  %v2391_v20 = vpop.f32.mrb[1].mxu1  ;;  %v222_v61 = vpop.f32.mrb[3].mxu0 }
 0x13a   :  { %v223_v5 = vadd.f32 %v3146_v14, %v222_v61 }
 0x13b   :  { %2699 = vtanh.f32 %v337_v19  ;;  %v2223_v23 = vmul.f32 -1.442695, %v337_v19 }
 0x13c   :  { %v3175_v62 = vpop.f32.mrb[4].mxu0 }
 0x13d   :  { %2701 = vpow2.f32 %v2223_v23  ;;  %v3177_v63 = vpop.f32.mrb[5].mxu0 }
 0x140   :  { %v3179_v2 = vpop.f32.mrb[6].mxu0 }
 0x141   :  { %v3181_v3 = vpop.f32.mrb[7].mxu0 }
 0x145   :  { %v2700_v21 = vpop.eup %2699 }
 0x146   :  { %353 = vrot.lane.b32.xlu0 %v2700_v21, %s2977_s27 }
 0x147   :  { %v2702_v24 = vpop.eup %2701 }
 0x148   :  { %v343_v25 = vadd.f32 1.0, %v2702_v24 }
 0x14a   :  { %348 = vrot.lane.b32.xlu0 %v260_v22, %s2978_s17  ;;  %2703 = vrcp.f32 %v343_v25 }
 0x154   :  { %v2704_v26 = vpop.eup %2703 }
 0x1b8   :  { %v354_v27 = vpop.permute.xlu0 %353 }
 0x1b9   :  { %v356_v28 = vmul.f32 %v2704_v26, %v354_v27 }
 0x1bb   :  { %358 = vrot.lane.b32.xlu1 %v356_v28, %s2978_s17 }
 0x1bc   :  { %v349_v29 = vpop.permute.xlu0 %348 }
 0x1bd   :  { %v351_v30 = vmul.f32 %v2704_v26, %v349_v29 }
 0x22d   :  { %v359_v31 = vpop.permute.xlu1 %358 }
 0x22e   :  { %v361_v32 = vadd.f32 %v359_v31, %v351_v30 }
 0x230   :  { %2705 = vtanh.f32 %v361_v32 }
 0x23a   :  { %v2706_v33 = vpop.eup %2705 }
 0x23b   :  { %364 = vrot.lane.b32.xlu1 %v2706_v33, %s2977_s27 }
 0x2ad   :  { %v365_v34 = vpop.permute.xlu1 %364 }
 0x2ae   :  { %v367_v35 = vmul.f32 %v2704_v26, %v365_v34  ;;  %v228_v26 = vadd.f32 %v2374_v60, %v3146_v14 }
 0x2b0   :  { %369 = vrot.lane.b32.xlu0 %v367_v35, %s2978_s17 }
 0x322   :  { %v370_v36 = vpop.permute.xlu0 %369 }
 0x323   :  { %372 = vst.msk [vmem:[#allocation3] sm:$0xff] %vm99_vm1, %v370_v36  ;;  %2401 = vmatmul.mubr.msk.f32.vlgmr.msra.gmra.mrb[2].mxu1 %vm99_vm1, %v370_v36 }
 0x324   :  { %2601 = vmatpush3.bf16.msra.mxu1 %v3121_v8  ;;  %2422 = vmatprep.mubr.msk.f32.mxu1 %vm2975_vm0, %v2976_v1 }
 0x325   :  { %2602 = vmatprep.subr.bf16.mxu1 %v2974_v0 }
 0x328   :  { %2604 = vmatpush3.bf16.msra.mxu1 %v3125_v12 }
 0x329   :  { %2611 = vmatprep.subr.bf16.mxu1 %v2974_v0 }
 0x3f6   :  { %v447_v38 = vpop.f32.mrb[2].mxu1 }
 0x3f7   :  { %v448_v39 = vadd.f32 %v447_v38, %v218_v37  ;;  %v2402_v40 = vpop.f32.mrb[3].mxu1 }
 0x3f9   :  { %2707 = vtanh.f32 %v448_v39  ;;  %v2225_v42 = vmul.f32 -1.442695, %v448_v39 }
 0x3fb   :  { %2709 = vpow2.f32 %v2225_v42 }
 0x403   :  { %v2708_v41 = vpop.eup %2707 }
 0x404   :  { %460 = vrot.lane.b32.xlu1 %v2708_v41, %s2977_s27 }
 0x405   :  { %v2710_v43 = vpop.eup %2709 }
 0x406   :  { %v454_v44 = vadd.f32 1.0, %v2710_v43 }
 0x408   :  { %2711 = vrcp.f32 %v454_v44  ;;  %v233_v44 = vadd.f32 %v3146_v14, %v3177_v63  ;;  %v238_v63 = vadd.f32 %v3175_v62, %v3146_v14 }
 0x412   :  { %v2712_v45 = vpop.eup %2711 }
 0x413   :  { %v458_v48 = vmul.f32 %v2712_v45, %v361_v32 }
 0x476   :  { %v461_v46 = vpop.permute.xlu1 %460 }
 0x477   :  { %v463_v47 = vmul.f32 %v2712_v45, %v461_v46 }
 0x479   :  { %465 = vrot.lane.b32.xlu0 %v463_v47, %s2978_s17 }
 0x4eb   :  { %v466_v49 = vpop.permute.xlu0 %465 }
 0x4ec   :  { %v468_v50 = vadd.f32 %v466_v49, %v458_v48 }
 0x4ee   :  { %2713 = vtanh.f32 %v468_v50 }
 0x4f8   :  { %v2714_v57 = vpop.eup %2713 }
 0x4f9   :  { %471 = vrot.lane.b32.xlu1 %v2714_v57, %s2977_s27 }
 0x56b   :  { %v472_v58 = vpop.permute.xlu1 %471 }
 0x56c   :  { %v474_v59 = vmul.f32 %v2712_v45, %v472_v58 }
 0x56e   :  { %476 = vrot.lane.b32.xlu0 %v474_v59, %s2978_s17 }
 0x5e0   :  { %v477_v4 = vpop.permute.xlu0 %476 }
 0x5e1   :  { %480 = vst.msk [vmem:[#allocation3 + $0x8] sm:$0xff] %vm99_vm1, %v477_v4  ;;  %2412 = vmatmul.mubr.msk.f32.vlgmr.msra.gmra.mrb[8].mxu0 %vm99_vm1, %v477_v4 }
 0x5e2   :  { %2607 = vmatpush3.bf16.msra.mxu0 %v3121_v8  ;;  %2433 = vmatprep.mubr.msk.f32.mxu0 %vm2975_vm0, %v2976_v1 }
 0x5e3   :  { %2608 = vmatprep.subr.bf16.mxu0 %v2974_v0 }
 0x5e6   :  { %2610 = vmatpush3.bf16.msra.mxu0 %v3125_v12 }
 0x5e7   :  { %2617 = vmatprep.subr.bf16.mxu0 %v2974_v0 }
 0x6b4   :  { %v555_v6 = vpop.f32.mrb[8].mxu0 }
 0x6b5   :  { %v556_v7 = vadd.f32 %v555_v6, %v223_v5  ;;  %v2413_v9 = vpop.f32.mrb[9].mxu0 }
 0x6b7   :  { %2715 = vtanh.f32 %v556_v7  ;;  %v2227_v11 = vmul.f32 -1.442695, %v556_v7 }
 0x6b9   :  { %2717 = vpow2.f32 %v2227_v11 }
 0x6c1   :  { %v2716_v10 = vpop.eup %2715 }
 0x6c2   :  { %568 = vrot.lane.b32.xlu1 %v2716_v10, %s2977_s27 }
 0x6c3   :  { %v2718_v13 = vpop.eup %2717 }
 0x6c4   :  { %v562_v15 = vadd.f32 1.0, %v2718_v13 }
 0x6c6   :  { %2719 = vrcp.f32 %v562_v15 }
 0x6d0   :  { %v2720_v16 = vpop.eup %2719 }
 0x6d1   :  { %v566_v19 = vmul.f32 %v2720_v16, %v468_v50 }
 0x734   :  { %v569_v17 = vpop.permute.xlu1 %568 }
 0x735   :  { %v571_v18 = vmul.f32 %v2720_v16, %v569_v17  ;;  %v1143_v17 = vld [vmem:[#allocation12] sm:$0xff] }
 0x737   :  { %573 = vrot.lane.b32.xlu0 %v571_v18, %s2978_s17  ;;  %v1144_v18 = vld [vmem:[#allocation12 + $0x8] sm:$0xff] }
 0x7a9   :  { %v574_v20 = vpop.permute.xlu0 %573 }
 0x7aa   :  { %v576_v21 = vadd.f32 %v574_v20, %v566_v19  ;;  %v2629_v19 = vpack.c.bf16 %v1144_v18, %v1143_v17 }
 0x7ac   :  { %2721 = vtanh.f32 %v576_v21 }
 0x7b6   :  { %v2722_v22 = vpop.eup %2721 }
 0x7b7   :  { %579 = vrot.lane.b32.xlu1 %v2722_v22, %s2977_s27 }
 0x829   :  { %v580_v23 = vpop.permute.xlu1 %579 }
 0x82a   :  { %v582_v24 = vmul.f32 %v2720_v16, %v580_v23  ;;  %v1145_v23 = vld [vmem:[#allocation12 + $0x10] sm:$0xff] }
 0x82c   :  { %584 = vrot.lane.b32.xlu0 %v582_v24, %s2978_s17  ;;  %v1146_v24 = vld [vmem:[#allocation12 + $0x18] sm:$0xff] }
 0x89e   :  { %v585_v25 = vpop.permute.xlu0 %584 }
 0x89f   :  { %588 = vst.msk [vmem:[#allocation3 + $0x10] sm:$0xff] %vm99_vm1, %v585_v25  ;;  %2423 = vmatmul.mubr.msk.f32.vlgmr.msra.gmra.mrb[4].mxu1 %vm99_vm1, %v585_v25  ;;  %v2633_v25 = vpack.c.bf16 %v1146_v24, %v1145_v23 }
 0x8a0   :  { %2613 = vmatpush3.bf16.msra.mxu1 %v3121_v8  ;;  %2444 = vmatprep.mubr.msk.f32.mxu1 %vm2975_vm0, %v2976_v1 }
 0x8a1   :  { %2614 = vmatprep.subr.bf16.mxu1 %v2974_v0 }
 0x8a4   :  { %2616 = vmatpush3.bf16.msra.mxu1 %v3125_v12 }
 0x8a5   :  { %2623 = vmatprep.subr.bf16.mxu1 %v2974_v0 }
 0x972   :  { %v663_v27 = vpop.f32.mrb[4].mxu1 }
 0x973   :  { %v664_v28 = vadd.f32 %v663_v27, %v228_v26  ;;  %v2424_v29 = vpop.f32.mrb[5].mxu1  ;;  %v1135_v27 = vld [vmem:[#allocation3] sm:$0xff] }
 0x974   :  { %v1137_v29 = vld [vmem:[#allocation3 + $0x10] sm:$0xff] }
 0x975   :  { %2723 = vtanh.f32 %v664_v28  ;;  %v2229_v31 = vmul.f32 -1.442695, %v664_v28  ;;  %v1136_v28 = vld [vmem:[#allocation3 + $0x8] sm:$0xff] }
 0x977   :  { %2725 = vpow2.f32 %v2229_v31 }
 0x97f   :  { %v2724_v30 = vpop.eup %2723 }
 0x980   :  { %676 = vrot.lane.b32.xlu1 %v2724_v30, %s2977_s27 }
 0x981   :  { %v2726_v32 = vpop.eup %2725 }
 0x982   :  { %v670_v33 = vadd.f32 1.0, %v2726_v32 }
 0x984   :  { %2727 = vrcp.f32 %v670_v33  ;;  %v243_v33 = vadd.f32 %v3146_v14, %v3181_v3 }
 0x98e   :  { %v2728_v34 = vpop.eup %2727 }
 0x98f   :  { %v674_v37 = vmul.f32 %v2728_v34, %v576_v21 }
 0x9f2   :  { %v677_v35 = vpop.permute.xlu1 %676 }
 0x9f3   :  { %v679_v36 = vmul.f32 %v2728_v34, %v677_v35 }
 0x9f5   :  { %681 = vrot.lane.b32.xlu0 %v679_v36, %s2978_s17 }
 0xa67   :  { %v682_v38 = vpop.permute.xlu0 %681 }
 0xa68   :  { %v684_v39 = vadd.f32 %v682_v38, %v674_v37 }
 0xa6a   :  { %2729 = vtanh.f32 %v684_v39 }
 0xa74   :  { %v2730_v40 = vpop.eup %2729 }
 0xa75   :  { %687 = vrot.lane.b32.xlu1 %v2730_v40, %s2977_s27 }
 0xae7   :  { %v688_v41 = vpop.permute.xlu1 %687 }
 0xae8   :  { %v690_v42 = vmul.f32 %v2728_v34, %v688_v41 }
 0xaea   :  { %692 = vrot.lane.b32.xlu0 %v690_v42, %s2978_s17 }
 0xb5c   :  { %v693_v43 = vpop.permute.xlu0 %692 }
 0xb5d   :  { %696 = vst.msk [vmem:[#allocation3 + $0x18] sm:$0xff] %vm99_vm1, %v693_v43  ;;  %2434 = vmatmul.mubr.msk.f32.vlgmr.msra.gmra.mrb[10].mxu0 %vm99_vm1, %v693_v43 }
 0xb5e   :  { %2619 = vmatpush3.bf16.msra.mxu0 %v3121_v8  ;;  %2455 = vmatprep.mubr.msk.f32.mxu0 %vm2975_vm0, %v2976_v1 }
 0xb5f   :  { %2620 = vmatprep.subr.bf16.mxu0 %v2974_v0 }
 0xb62   :  { %2622 = vmatpush3.bf16.msra.mxu0 %v3125_v12 }
 0xb63   :  { %2630 = vmatprep.subr.bf16.mxu0 %v2629_v19 }
 0xb64   :  { %v1138_v30 = vld [vmem:[#allocation3 + $0x18] sm:$0xff] }
 0xc30   :  { %v771_v45 = vpop.f32.mrb[10].mxu0 }
 0xc31   :  { %v772_v46 = vadd.f32 %v771_v45, %v233_v44  ;;  %v2435_v47 = vpop.f32.mrb[11].mxu0 }
 0xc33   :  { %2731 = vtanh.f32 %v772_v46  ;;  %v2231_v49 = vmul.f32 -1.442695, %v772_v46 }
 0xc35   :  { %2733 = vpow2.f32 %v2231_v49 }
 0xc3d   :  { %v2732_v48 = vpop.eup %2731 }
 0xc3e   :  { %784 = vrot.lane.b32.xlu1 %v2732_v48, %s2977_s27 }
 0xc3f   :  { %v2734_v50 = vpop.eup %2733 }
 0xc40   :  { %v778_v51 = vadd.f32 1.0, %v2734_v50 }
 0xc42   :  { %2735 = vrcp.f32 %v778_v51 }
 0xc4c   :  { %v2736_v52 = vpop.eup %2735 }
 0xc4d   :  { %v782_v55 = vmul.f32 %v2736_v52, %v684_v39 }
 0xcb0   :  { %v785_v53 = vpop.permute.xlu1 %784 }
 0xcb1   :  { %v787_v54 = vmul.f32 %v2736_v52, %v785_v53  ;;  %v1295_v53 = vld [vmem:[#allocation14] sm:$0xff] }
 0xcb3   :  { %789 = vrot.lane.b32.xlu0 %v787_v54, %s2978_s17  ;;  %v1296_v54 = vld [vmem:[#allocation14 + $0x8] sm:$0xff] }
 0xd25   :  { %v790_v56 = vpop.permute.xlu0 %789 }
 0xd26   :  { %v792_v57 = vadd.f32 %v790_v56, %v782_v55  ;;  %v3263_v55 = vpack.c.bf16 %v1296_v54, %v1295_v53  ;;  %v1297_v56 = vld [vmem:[#allocation14 + $0x10] sm:$0xff] }
 0xd28   :  { %2737 = vtanh.f32 %v792_v57 }
 0xd32   :  { %v2738_v58 = vpop.eup %2737 }
 0xd33   :  { %795 = vrot.lane.b32.xlu1 %v2738_v58, %s2977_s27 }
 0xda5   :  { %v796_v59 = vpop.permute.xlu1 %795 }
 0xda6   :  { %v798_v60 = vmul.f32 %v2736_v52, %v796_v59 }
 0xda8   :  { %800 = vrot.lane.b32.xlu0 %v798_v60, %s2978_s17 }
 0xe1a   :  { %v801_v61 = vpop.permute.xlu0 %800 }
 0xe1b   :  { %804 = vst.msk [vmem:[#allocation3 + $0x20] sm:$0xff] %vm99_vm1, %v801_v61  ;;  %2445 = vmatmul.mubr.msk.f32.vlgmr.msra.gmra.mrb[6].mxu1 %vm99_vm1, %v801_v61  ;;  %v1294_v61 = vld [vmem:[#allocation5 + $0x8] sm:$0xff] }
 0xe1c   :  { %2625 = vmatpush3.bf16.msra.mxu1 %v3121_v8  ;;  %2466 = vmatprep.mubr.msk.f32.mxu1 %vm2975_vm0, %v2976_v1 }
 0xe1d   :  { %2626 = vmatprep.subr.bf16.mxu1 %v2974_v0 }
 0xe20   :  { %2628 = vmatpush3.bf16.msra.mxu1 %v3125_v12 }
 0xe21   :  { %2637 = vmatprep.subr.bf16.mxu1 %v2974_v0 }
 0xe22   :  { %v1139_v31 = vld [vmem:[#allocation3 + $0x20] sm:$0xff] }
 0xeee   :  { %v879_v4 = vpop.f32.mrb[6].mxu1 }
 0xeef   :  { %v880_v5 = vadd.f32 %v879_v4, %v238_v63  ;;  %v2446_v6 = vpop.f32.mrb[7].mxu1  ;;  %v1292_v4 = vld [vmem:[#allocation4 + $0x8] sm:$0xff] }
 0xef0   :  { %v248_v6 = vadd.f32 %v3179_v2, %v3146_v14 }
 0xef1   :  { %2739 = vtanh.f32 %v880_v5  ;;  %v2233_v8 = vmul.f32 -1.442695, %v880_v5 }
 0xef3   :  { %2741 = vpow2.f32 %v2233_v8 }
 0xefb   :  { %v2740_v7 = vpop.eup %2739 }
 0xefc   :  { %892 = vrot.lane.b32.xlu1 %v2740_v7, %s2977_s27 }
 0xefd   :  { %v2742_v9 = vpop.eup %2741 }
 0xefe   :  { %v886_v10 = vadd.f32 1.0, %v2742_v9 }
 0xf00   :  { %2743 = vrcp.f32 %v886_v10  ;;  %v3294_v10 = vld [vmem:[%s3460_s6] ss:$0 sm:$0xff]  ;;  %s2979_s6 = smov 96  }
 0xf0a   :  { %v2744_v11 = vpop.eup %2743 }
 0xf0b   :  { %v890_v15 = vmul.f32 %v2744_v11, %v792_v57  ;;  %v1298_v57 = vld [vmem:[#allocation14 + $0x18] sm:$0xff] }
 0xf0c   :  { %v3267_v58 = vpack.c.bf16 %v1298_v57, %v1297_v56 }
 0xf6e   :  { %v893_v13 = vpop.permute.xlu1 %892 }
 0xf6f   :  { %v895_v12 = vmul.f32 %v2744_v11, %v893_v13 }
 0xf71   :  { %897 = vrot.lane.b32.xlu0 %v895_v12, %s2978_s17 }
 0xfe3   :  { %v898_v16 = vpop.permute.xlu0 %897 }
 0xfe4   :  { %v900_v62 = vadd.f32 %v898_v16, %v890_v15 }
 0xfe6   :  { %2745 = vtanh.f32 %v900_v62 }
 0xff0   :  { %v2746_v20 = vpop.eup %2745 }
 0xff1   :  { %903 = vrot.lane.b32.xlu1 %v2746_v20, %s2977_s27 }
0x1063   :  { %v904_v21 = vpop.permute.xlu1 %903 }
0x1064   :  { %v906_v22 = vmul.f32 %v2744_v11, %v904_v21 }
0x1066   :  { %908 = vrot.lane.b32.xlu0 %v906_v22, %s2978_s17 }
0x10d8   :  { %v909_v26 = vpop.permute.xlu0 %908 }
0x10d9   :  { %912 = vst.msk [vmem:[#allocation3 + $0x28] sm:$0xff] %vm99_vm1, %v909_v26  ;;  %2456 = vmatmul.mubr.msk.f32.vlgmr.msra.gmra.mrb[12].mxu0 %vm99_vm1, %v909_v26 }
0x10da   :  { %2632 = vmatpush3.bf16.msra.mxu0 %v2629_v19  ;;  %2477 = vmatprep.mubr.msk.f32.mxu0 %vm99_vm1, %v1135_v27 }
0x10db   :  { %2634 = vmatprep.subr.bf16.mxu0 %v2633_v25 }
0x10de   :  { %2636 = vmatpush3.bf16.msra.mxu0 %v2633_v25 }
0x10df   :  { %2649 = vmatprep.subr.bf16.mxu0 %v2974_v0 }
0x10e0   :  { %v1140_v32 = vld [vmem:[#allocation3 + $0x28] sm:$0xff] }
0x10e1   :  { %2478 = vmatmul.mubr.msk.f32.vlgmr.msra.gmra.mrb[14].mxu0 %vm99_vm1, %v1136_v28 }
0x10e2   :  { %2480 = vmatprep.mubr.msk.f32.mxu0 %vm99_vm1, %v1137_v29  ;;  %2651 = vmatpush3.bf16.msra.mxu0 %v3263_v55 }
0x10e3   :  { %2652 = vmatprep.subr.bf16.mxu0 %v2974_v0 }
0x10e5   :  { %2481 = vmatmul.mubr.msk.f32.gmra.mrb[16].mxu0 %vm99_vm1, %v1138_v30 }
0x10e6   :  { %2483 = vmatprep.mubr.msk.f32.mxu0 %vm99_vm1, %v1139_v31  ;;  %2654 = vmatpush3.bf16.msra.mxu0 %v3267_v58 }
0x10e7   :  { %2661 = vmatprep.subr.bf16.mxu0 %v2974_v0 }
0x10e9   :  { %2484 = vmatmul.mubr.msk.f32.gmra.mrb[18].mxu0 %vm99_vm1, %v1140_v32 }
0x11ac   :  { %v987_v34 = vpop.f32.mrb[12].mxu0 }
0x11ad   :  { %v988_v35 = vadd.f32 %v987_v34, %v243_v33  ;;  %v2457_v36 = vpop.f32.mrb[13].mxu0 }
0x11af   :  { %2747 = vtanh.f32 %v988_v35  ;;  %v2235_v44 = vmul.f32 -1.442695, %v988_v35 }
0x11b1   :  { %2749 = vpow2.f32 %v2235_v44 }
0x11b4   :  { %v3247_v37 = vpop.f32.mrb[14].mxu0 }
0x11b5   :  { %v1244_v38 = vpop.f32.mrb[15].mxu0 }
0x11b6   :  { %v1245_v11 = vadd.f32 %v3294_v10, %v1244_v38 }
0x11b8   :  { %v3249_v39 = vpop.f32.mrb[16].mxu0 }
0x11b9   :  { %v2748_v40 = vpop.eup %2747  ;;  %v3251_v41 = vpop.f32.mrb[17].mxu0 }
0x11ba   :  { %1000 = vrot.lane.b32.xlu1 %v2748_v40, %s2977_s27 }
0x11bb   :  { %v2750_v3 = vpop.eup %2749 }
0x11bc   :  { %v3254_v42 = vpop.f32.mrb[18].mxu0  ;;  %v994_v45 = vadd.f32 1.0, %v2750_v3 }
0x11bd   :  { %v3256_v43 = vpop.f32.mrb[19].mxu0 }
0x11be   :  { %2751 = vrcp.f32 %v994_v45  ;;  %v1250_v45 = vadd.f32 %v3247_v37, %v3294_v10 }
0x11c8   :  { %v2752_v46 = vpop.eup %2751 }
0x11c9   :  { %v998_v49 = vmul.f32 %v2752_v46, %v900_v62 }
0x122c   :  { %v1001_v47 = vpop.permute.xlu1 %1000 }
0x122d   :  { %v1003_v48 = vmul.f32 %v2752_v46, %v1001_v47 }
0x122f   :  { %1005 = vrot.lane.b32.xlu0 %v1003_v48, %s2978_s17 }
0x12a1   :  { %v1006_v50 = vpop.permute.xlu0 %1005 }
0x12a2   :  { %v3259_v51 = vadd.f32 %v1006_v50, %v998_v49 }
0x12a4   :  { %2753 = vtanh.f32 %v3259_v51 }
0x12ae   :  { %v2754_v52 = vpop.eup %2753 }
0x12af   :  { %1011 = vrot.lane.b32.xlu1 %v2754_v52, %s2977_s27 }
0x1321   :  { %v1012_v59 = vpop.permute.xlu1 %1011 }
0x1322   :  { %v1014_v60 = vmul.f32 %v2752_v46, %v1012_v59 }
0x1324   :  { %1016 = vrot.lane.b32.xlu0 %v1014_v60, %s2978_s17 }
0x1328   :  { %1381 = vrot.lane.b32.xlu0 %v1294_v61, %s2978_s17 }
0x1396   :  { %v1017_v63 = vpop.permute.xlu0 %1016 }
0x1397   :  { %1020 = vst.msk [vmem:[#allocation3 + $0x30] sm:$0xff] %vm99_vm1, %v1017_v63  ;;  %2467 = vmatmul.mubr.msk.f32.vlgmr.msra.gmra.mrb[8].mxu1 %vm99_vm1, %v1017_v63 }
0x1398   :  { %2639 = vmatpush3.bf16.msra.mxu1 %v3263_v55  ;;  %2497 = vmatprep.mubr.msk.f32.mxu1 %vm2975_vm0, %v2976_v1 }
0x1399   :  { %2640 = vmatprep.subr.bf16.mxu1 %v2974_v0 }
0x139a   :  { %v1382_v20 = vpop.permute.xlu0 %1381 }
0x139c   :  { %2642 = vmatpush3.bf16.msra.mxu1 %v3267_v58 }
0x139d   :  { %2643 = vmatprep.subr.bf16.mxu1 %v2974_v0 }
0x139e   :  { %v1141_v5 = vld [vmem:[#allocation3 + $0x30] sm:$0xff] }
0x139f   :  { %2498 = vmatmul.mubr.msk.f32.vlgmr.msra.gmra.mrb[10].mxu1 %vm99_vm1, %v1292_v4  ;;  %2486 = vmatprep.mubr.msk.f32.mxu0 %vm99_vm1, %v1141_v5 }
0x13a0   :  { %2645 = vmatpush3.bf16.msra.mxu1 %v3263_v55  ;;  %2508 = vmatprep.mubr.msk.f32.mxu1 %vm2975_vm0, %v2976_v1 }
0x13a1   :  { %2646 = vmatprep.subr.bf16.mxu1 %v2974_v0 }
0x13a4   :  { %2648 = vmatpush3.bf16.msra.mxu1 %v3267_v58 }
0x13a5   :  { %2655 = vmatprep.subr.bf16.mxu1 %v2974_v0 }
0x146a   :  { %v1095_v7 = vpop.f32.mrb[8].mxu1 }
0x146b   :  { %v1096_v8 = vadd.f32 %v1095_v7, %v248_v6  ;;  %v2468_v9 = vpop.f32.mrb[9].mxu1 }
0x146c   :  { %v1255_v9 = vadd.f32 %v3294_v10, %v3251_v41 }
0x146d   :  { %v2237_v26 = vmul.f32 -1.442695, %v1096_v8 }
0x1472   :  { %v1369_v13 = vpop.f32.mrb[10].mxu1 }
0x1473   :  { %v1370_v12 = vadd.f32 %v1369_v13, %v1245_v11  ;;  %v2499_v15 = vpop.f32.mrb[11].mxu1 }
0x1475   :  { %2755 = vtanh.f32 %v1370_v12  ;;  %v2248_v62 = vmul.f32 -1.442695, %v1370_v12 }
0x1477   :  { %2757 = vpow2.f32 %v2248_v62 }
0x147f   :  { %v2756_v16 = vpop.eup %2755 }
0x1480   :  { %1386 = vrot.lane.b32.xlu1 %v2756_v16, %s2977_s27 }
0x1481   :  { %v2758_v14 = vpop.eup %2757 }
0x1482   :  { %v1376_v2 = vadd.f32 1.0, %v2758_v14 }
0x1484   :  { %2759 = vrcp.f32 %v1376_v2 }
0x148e   :  { %v2760_v17 = vpop.eup %2759 }
0x148f   :  { %v1384_v21 = vmul.f32 %v2760_v17, %v1382_v20 }
0x14f2   :  { %v1387_v18 = vpop.permute.xlu1 %1386 }
0x14f3   :  { %v1389_v19 = vmul.f32 %v2760_v17, %v1387_v18 }
0x14f5   :  { %1391 = vrot.lane.b32.xlu1 %v1389_v19, %s2978_s17 }
0x1567   :  { %v1392_v22 = vpop.permute.xlu1 %1391 }
0x1568   :  { %v1394_v23 = vadd.f32 %v1392_v22, %v1384_v21 }
0x156a   :  { %2761 = vtanh.f32 %v1394_v23 }
0x156b   :  { %2763 = vtanh.f32 %v1096_v8 }
0x156c   :  { %2765 = vpow2.f32 %v2237_v26 }
0x1574   :  { %v2762_v24 = vpop.eup %2761 }
0x1575   :  { %1397 = vrot.lane.b32.xlu0 %v2762_v24, %s2977_s27  ;;  %v2764_v25 = vpop.eup %2763 }
0x1576   :  { %v2766_v27 = vpop.eup %2765 }
0x1577   :  { %v1102_v28 = vadd.f32 1.0, %v2766_v27 }
0x1579   :  { %1108 = vrot.lane.b32.xlu0 %v2764_v25, %s2977_s27  ;;  %2767 = vrcp.f32 %v1102_v28  ;;  %v1260_v25 = vadd.f32 %v3249_v39, %v3294_v10 }
0x1583   :  { %v2768_v31 = vpop.eup %2767 }
0x1584   :  { %v1106_v35 = vmul.f32 %v2768_v31, %v3259_v51 }
0x15e7   :  { %v1398_v29 = vpop.permute.xlu0 %1397 }
0x15e8   :  { %v3301_v30 = vmul.f32 %v2760_v17, %v1398_v29 }
0x15ea   :  { %1413 = vrot.lane.b32.xlu1 %v3301_v30, %s2978_s17 }
0x15eb   :  { %v1109_v32 = vpop.permute.xlu0 %1108 }
0x15ec   :  { %v1111_v33 = vmul.f32 %v2768_v31, %v1109_v32 }
0x15ee   :  { %1113 = vrot.lane.b32.xlu0 %v1111_v33, %s2978_s17 }
0x165c   :  { %v1414_v34 = vpop.permute.xlu1 %1413 }
0x165d   :  { %2509 = vmatmul.mubr.msk.f32.vlgmr.msra.gmra.mrb[12].mxu1 %vm99_vm1, %v1414_v34 }
0x165e   :  { %2657 = vmatpush3.bf16.msra.mxu1 %v3263_v55  ;;  %2530 = vmatprep.mubr.msk.f32.mxu1 %vm2975_vm0, %v2976_v1 }
0x165f   :  { %2658 = vmatprep.subr.bf16.mxu1 %v2974_v0 }
0x1660   :  { %v1114_v36 = vpop.permute.xlu0 %1113 }
0x1661   :  { %v3312_v38 = vadd.f32 %v1114_v36, %v1106_v35 }
0x1662   :  { %2660 = vmatpush3.bf16.msra.mxu1 %v3267_v58 }
0x1663   :  { %2769 = vtanh.f32 %v3312_v38  ;;  %2667 = vmatprep.subr.bf16.mxu1 %v2974_v0 }
0x166d   :  { %v2770_v40 = vpop.eup %2769 }
0x166e   :  { %1119 = vrot.lane.b32.xlu0 %v2770_v40, %s2977_s27 }
0x16e0   :  { %v1120_v44 = vpop.permute.xlu0 %1119 }
0x16e1   :  { %v1122_v3 = vmul.f32 %v2768_v31, %v1120_v44 }
0x16e3   :  { %1124 = vrot.lane.b32.xlu0 %v1122_v3, %s2978_s17 }
0x1730   :  { %v1483_v46 = vpop.f32.mrb[12].mxu1 }
0x1731   :  { %v1484_v47 = vadd.f32 %v1483_v46, %v1250_v45  ;;  %v2510_v48 = vpop.f32.mrb[13].mxu1 }
0x1732   :  { %v1265_v48 = vadd.f32 %v3294_v10, %v3256_v43 }
0x1733   :  { %2771 = vtanh.f32 %v1484_v47  ;;  %v2250_v52 = vmul.f32 -1.442695, %v1484_v47 }
0x1735   :  { %2773 = vpow2.f32 %v2250_v52 }
0x173d   :  { %v2772_v49 = vpop.eup %2771 }
0x173e   :  { %1496 = vrot.lane.b32.xlu1 %v2772_v49, %s2977_s27 }
0x173f   :  { %v2774_v37 = vpop.eup %2773 }
0x1740   :  { %v1490_v53 = vadd.f32 1.0, %v2774_v37 }
0x1742   :  { %2775 = vrcp.f32 %v1490_v53 }
0x174c   :  { %v2776_v54 = vpop.eup %2775 }
0x174d   :  { %v1494_v59 = vmul.f32 %v2776_v54, %v1394_v23 }
0x1755   :  { %v1125_v50 = vpop.permute.xlu0 %1124 }
0x1756   :  { %1128 = vst.msk [vmem:[#allocation3 + $0x38] sm:$0xff] %vm99_vm1, %v1125_v50  ;;  %1129 = vst.msk [vmem:[#allocation4] sm:$0xff] %vm99_vm1, %v1125_v50 }
0x175d   :  { %v1142_v51 = vld [vmem:[#allocation3 + $0x38] sm:$0xff] }
0x175e   :  { %2487 = vmatmul.mubr.msk.f32.gmra.mrb[20].mxu0 %vm99_vm1, %v1142_v51 }
0x175f   :  { %2519 = vmatprep.mubr.msk.f32.mxu0 %vm2975_vm0, %v2976_v1 }
0x17b0   :  { %v1497_v56 = vpop.permute.xlu1 %1496 }
0x17b1   :  { %v1499_v57 = vmul.f32 %v2776_v54, %v1497_v56 }
0x17b3   :  { %1501 = vrot.lane.b32.xlu1 %v1499_v57, %s2978_s17 }
0x1825   :  { %v1502_v60 = vpop.permute.xlu1 %1501 }
0x1826   :  { %v1504_v61 = vadd.f32 %v1502_v60, %v1494_v59 }
0x1828   :  { %2777 = vtanh.f32 %v1504_v61 }
0x1831   :  { %v3328_v63 = vpop.f32.mrb[20].mxu0 }
0x1832   :  { %v2778_v4 = vpop.eup %2777  ;;  %v3330_v5 = vpop.f32.mrb[21].mxu0 }
0x1833   :  { %1507 = vrot.lane.b32.xlu1 %v2778_v4, %s2977_s27 }
0x18a5   :  { %v1508_v6 = vpop.permute.xlu1 %1507 }
0x18a6   :  { %v3333_v7 = vmul.f32 %v2776_v54, %v1508_v6 }
0x18a8   :  { %1524 = vrot.lane.b32.xlu1 %v3333_v7, %s2978_s17 }
0x191a   :  { %v1525_v8 = vpop.permute.xlu1 %1524 }
0x191b   :  { %2520 = vmatmul.mubr.msk.f32.vlgmr.msra.gmra.mrb[22].mxu0 %vm99_vm1, %v1525_v8 }
0x191c   :  { %2663 = vmatpush3.bf16.msra.mxu0 %v3263_v55  ;;  %2541 = vmatprep.mubr.msk.f32.mxu0 %vm2975_vm0, %v2976_v1 }
0x191d   :  { %2664 = vmatprep.subr.bf16.mxu0 %v2974_v0 }
0x1920   :  { %2666 = vmatpush3.bf16.msra.mxu0 %v3267_v58 }
0x1921   :  { %2673 = vmatprep.subr.bf16.mxu0 %v2974_v0 }
0x19ee   :  { %v1594_v11 = vpop.f32.mrb[22].mxu0 }
0x19ef   :  { %v1595_v13 = vadd.f32 %v1594_v11, %v1255_v9  ;;  %v2521_v12 = vpop.f32.mrb[23].mxu0  ;;  %v1270_v11 = vadd.f32 %v3254_v42, %v3294_v10 }
0x19f1   :  { %2779 = vtanh.f32 %v1595_v13  ;;  %v2252_v16 = vmul.f32 -1.442695, %v1595_v13 }
0x19f3   :  { %2781 = vpow2.f32 %v2252_v16 }
0x19fb   :  { %v2780_v15 = vpop.eup %2779 }
0x19fc   :  { %1607 = vrot.lane.b32.xlu0 %v2780_v15, %s2977_s27 }
0x19fd   :  { %v2782_v62 = vpop.eup %2781 }
0x19fe   :  { %v1601_v14 = vadd.f32 1.0, %v2782_v62 }
0x1a00   :  { %2783 = vrcp.f32 %v1601_v14 }
0x1a0a   :  { %v2784_v2 = vpop.eup %2783 }
0x1a0b   :  { %v1605_v19 = vmul.f32 %v2784_v2, %v1504_v61 }
0x1a6e   :  { %v1608_v17 = vpop.permute.xlu0 %1607 }
0x1a6f   :  { %v1610_v18 = vmul.f32 %v2784_v2, %v1608_v17 }
0x1a71   :  { %1612 = vrot.lane.b32.xlu1 %v1610_v18, %s2978_s17 }
0x1ae3   :  { %v1613_v20 = vpop.permute.xlu1 %1612 }
0x1ae4   :  { %v1615_v41 = vadd.f32 %v1613_v20, %v1605_v19 }
0x1ae6   :  { %2785 = vtanh.f32 %v1615_v41 }
0x1af0   :  { %v2786_v21 = vpop.eup %2785 }
0x1af1   :  { %1618 = vrot.lane.b32.xlu0 %v2786_v21, %s2977_s27  ;;  %v1275_v21 = vadd.f32 %v3294_v10, %v3330_v5 }
0x1b63   :  { %v1619_v22 = vpop.permute.xlu0 %1618 }
0x1b64   :  { %v3349_v23 = vmul.f32 %v2784_v2, %v1619_v22 }
0x1b66   :  { %1635 = vrot.lane.b32.xlu1 %v3349_v23, %s2978_s17 }
0x1bd8   :  { %v1636_v24 = vpop.permute.xlu1 %1635 }
0x1bd9   :  { %2531 = vmatmul.mubr.msk.f32.vlgmr.msra.gmra.mrb[14].mxu1 %vm99_vm1, %v1636_v24 }
0x1bda   :  { %2669 = vmatpush3.bf16.msra.mxu1 %v3263_v55  ;;  %2552 = vmatprep.mubr.msk.f32.mxu1 %vm2975_vm0, %v2976_v1 }
0x1bdb   :  { %2670 = vmatprep.subr.bf16.mxu1 %v2974_v0 }
0x1bde   :  { %2672 = vmatpush3.bf16.msra.mxu1 %v3267_v58 }
0x1bdf   :  { %2679 = vmatprep.subr.bf16.mxu1 %v2974_v0 }
0x1cac   :  { %v1705_v26 = vpop.f32.mrb[14].mxu1 }
0x1cad   :  { %v1706_v27 = vadd.f32 %v1705_v26, %v1260_v25  ;;  %v2532_v28 = vpop.f32.mrb[15].mxu1 }
0x1caf   :  { %2787 = vtanh.f32 %v1706_v27  ;;  %v2254_v31 = vmul.f32 -1.442695, %v1706_v27 }
0x1cb1   :  { %2789 = vpow2.f32 %v2254_v31 }
0x1cb9   :  { %v2788_v29 = vpop.eup %2787 }
0x1cba   :  { %1718 = vrot.lane.b32.xlu0 %v2788_v29, %s2977_s27 }
0x1cbb   :  { %v2790_v32 = vpop.eup %2789 }
0x1cbc   :  { %v1712_v33 = vadd.f32 1.0, %v2790_v32 }
0x1cbe   :  { %2791 = vrcp.f32 %v1712_v33 }
0x1cc8   :  { %v2792_v34 = vpop.eup %2791 }
0x1cc9   :  { %v1716_v40 = vmul.f32 %v2792_v34, %v1615_v41 }
0x1d2c   :  { %v1719_v35 = vpop.permute.xlu0 %1718 }
0x1d2d   :  { %v1721_v36 = vmul.f32 %v2792_v34, %v1719_v35 }
0x1d2f   :  { %1723 = vrot.lane.b32.xlu1 %v1721_v36, %s2978_s17 }
0x1da1   :  { %v1724_v44 = vpop.permute.xlu1 %1723 }
0x1da2   :  { %v1726_v39 = vadd.f32 %v1724_v44, %v1716_v40 }
0x1da4   :  { %2793 = vtanh.f32 %v1726_v39 }
0x1dae   :  { %v2794_v3 = vpop.eup %2793 }
0x1daf   :  { %1729 = vrot.lane.b32.xlu0 %v2794_v3, %s2977_s27  ;;  %v1280_v3 = vadd.f32 %v3328_v63, %v3294_v10  ;;  %v1622_v10 = vmax.f32 %v3349_v23, 0.0 }
0x1e21   :  { %v1730_v45 = vpop.permute.xlu0 %1729 }
0x1e22   :  { %v3365_v46 = vmul.f32 %v2792_v34, %v1730_v45 }
0x1e24   :  { %1746 = vrot.lane.b32.xlu1 %v3365_v46, %s2978_s17 }
0x1e96   :  { %v1747_v47 = vpop.permute.xlu1 %1746 }
0x1e97   :  { %2542 = vmatmul.mubr.msk.f32.vlgmr.msra.gmra.mrb[24].mxu0 %vm99_vm1, %v1747_v47 }
0x1e98   :  { %2675 = vmatpush3.bf16.msra.mxu0 %v3263_v55  ;;  %2563 = vmatprep.mubr.msk.f32.mxu0 %vm2975_vm0, %v2976_v1 }
0x1e99   :  { %2676 = vmatprep.subr.bf16.mxu0 %v2974_v0 }
0x1e9c   :  { %2678 = vmatpush3.bf16.msra.mxu0 %v3267_v58 }
0x1f6a   :  { %v1816_v49 = vpop.f32.mrb[24].mxu0 }
0x1f6b   :  { %v1817_v50 = vadd.f32 %v1816_v49, %v1265_v48  ;;  %v2543_v51 = vpop.f32.mrb[25].mxu0 }
0x1f6d   :  { %2795 = vtanh.f32 %v1817_v50  ;;  %v2256_v37 = vmul.f32 -1.442695, %v1817_v50 }
0x1f6f   :  { %2797 = vpow2.f32 %v2256_v37 }
0x1f77   :  { %v2796_v52 = vpop.eup %2795 }
0x1f78   :  { %1829 = vrot.lane.b32.xlu0 %v2796_v52, %s2977_s27 }
0x1f79   :  { %v2798_v53 = vpop.eup %2797 }
0x1f7a   :  { %v1823_v54 = vadd.f32 1.0, %v2798_v53 }
0x1f7c   :  { %2799 = vrcp.f32 %v1823_v54 }
0x1f86   :  { %v2800_v56 = vpop.eup %2799 }
0x1f87   :  { %v1827_v60 = vmul.f32 %v2800_v56, %v1726_v39 }
0x1fea   :  { %v1830_v57 = vpop.permute.xlu0 %1829 }
0x1feb   :  { %v1832_v59 = vmul.f32 %v2800_v56, %v1830_v57 }
0x1fed   :  { %1834 = vrot.lane.b32.xlu1 %v1832_v59, %s2978_s17 }
0x205f   :  { %v1835_v61 = vpop.permute.xlu1 %1834 }
0x2060   :  { %v1837_v43 = vadd.f32 %v1835_v61, %v1827_v60 }
0x2062   :  { %2801 = vtanh.f32 %v1837_v43 }
0x206c   :  { %v2802_v4 = vpop.eup %2801 }
0x206d   :  { %1840 = vrot.lane.b32.xlu0 %v2802_v4, %s2977_s27 }
0x20df   :  { %v1841_v6 = vpop.permute.xlu0 %1840 }
0x20e0   :  { %v3380_v8 = vmul.f32 %v2800_v56, %v1841_v6  ;;  %v1401_v56 = vmax.f32 %v3301_v30, 0.0  ;;  %v1511_v6 = vmax.f32 %v3333_v7, 0.0 }
0x20e2   :  { %1857 = vrot.lane.b32.xlu1 %v3380_v8, %s2978_s17  ;;  %v1844_v63 = vmax.f32 %v3380_v8, 0.0  ;;  %v1733_v8 = vmax.f32 %v3365_v46, 0.0 }
0x2154   :  { %v1858_v9 = vpop.permute.xlu1 %1857 }
0x2155   :  { %2553 = vmatmul.mubr.msk.f32.vlgmr.msra.gmra.mrb[16].mxu1 %vm99_vm1, %v1858_v9 }
0x2156   :  { %2681 = vmatpush3.bf16.msra.mxu1 %v3263_v55  ;;  %2574 = vmatprep.mubr.msk.f32.mxu1 %vm2975_vm0, %v2976_v1 }
0x2157   :  { %2682 = vmatprep.subr.bf16.mxu1 %v2974_v0 }
0x215a   :  { %2684 = vmatpush3.bf16.msra.mxu1 %v3267_v58 }
0x2228   :  { %v1927_v13 = vpop.f32.mrb[16].mxu1 }
0x2229   :  { %v1928_v12 = vadd.f32 %v1927_v13, %v1270_v11  ;;  %v2554_v15 = vpop.f32.mrb[17].mxu1 }
0x222b   :  { %2803 = vtanh.f32 %v1928_v12  ;;  %v2258_v62 = vmul.f32 -1.442695, %v1928_v12 }
0x222d   :  { %2805 = vpow2.f32 %v2258_v62 }
0x2235   :  { %v2804_v16 = vpop.eup %2803 }
0x2236   :  { %1940 = vrot.lane.b32.xlu0 %v2804_v16, %s2977_s27 }
0x2237   :  { %v2806_v55 = vpop.eup %2805 }
0x2238   :  { %v1934_v14 = vadd.f32 1.0, %v2806_v55 }
0x223a   :  { %2807 = vrcp.f32 %v1934_v14 }
0x2244   :  { %v2808_v1 = vpop.eup %2807 }
0x2245   :  { %v1938_v58 = vmul.f32 %v2808_v1, %v1837_v43 }
0x22a8   :  { %v1941_v2 = vpop.permute.xlu0 %1940 }
0x22a9   :  { %v1943_v0 = vmul.f32 %v2808_v1, %v1941_v2 }
0x22ab   :  { %1945 = vrot.lane.b32.xlu1 %v1943_v0, %s2978_s17 }
0x231d   :  { %v1946_v17 = vpop.permute.xlu1 %1945 }
0x231e   :  { %v1948_v42 = vadd.f32 %v1946_v17, %v1938_v58 }
0x2320   :  { %2809 = vtanh.f32 %v1948_v42 }
0x232a   :  { %v2810_v18 = vpop.eup %2809 }
0x232b   :  { %1951 = vrot.lane.b32.xlu0 %v2810_v18, %s2977_s27 }
0x239d   :  { %v1952_v19 = vpop.permute.xlu0 %1951 }
0x239e   :  { %v3395_v20 = vmul.f32 %v2808_v1, %v1952_v19 }
0x23a0   :  { %1968 = vrot.lane.b32.xlu1 %v3395_v20, %s2978_s17  ;;  %v1955_v11 = vmax.f32 %v3395_v20, 0.0 }
0x2412   :  { %v1969_v41 = vpop.permute.xlu1 %1968 }
0x2413   :  { %2564 = vmatmul.mubr.msk.f32.vlgmr.msra.gmra.mrb[26].mxu0 %vm99_vm1, %v1969_v41 }
0x24e6   :  { %v2038_v22 = vpop.f32.mrb[26].mxu0 }
0x24e7   :  { %v2039_v24 = vadd.f32 %v2038_v22, %v1275_v21  ;;  %v2565_v25 = vpop.f32.mrb[27].mxu0 }
0x24e9   :  { %2811 = vtanh.f32 %v2039_v24  ;;  %v2260_v27 = vmul.f32 -1.442695, %v2039_v24 }
0x24eb   :  { %2813 = vpow2.f32 %v2260_v27 }
0x24f3   :  { %v2812_v26 = vpop.eup %2811 }
0x24f4   :  { %2051 = vrot.lane.b32.xlu0 %v2812_v26, %s2977_s27 }
0x24f5   :  { %v2814_v28 = vpop.eup %2813 }
0x24f6   :  { %v2045_v29 = vadd.f32 1.0, %v2814_v28 }
0x24f8   :  { %2815 = vrcp.f32 %v2045_v29 }
0x2502   :  { %v2816_v31 = vpop.eup %2815 }
0x2503   :  { %v2049_v34 = vmul.f32 %v2816_v31, %v1948_v42 }
0x2566   :  { %v2052_v32 = vpop.permute.xlu0 %2051 }
0x2567   :  { %v2054_v33 = vmul.f32 %v2816_v31, %v2052_v32 }
0x2569   :  { %2056 = vrot.lane.b32.xlu1 %v2054_v33, %s2978_s17 }
0x25db   :  { %v2057_v35 = vpop.permute.xlu1 %2056 }
0x25dc   :  { %v2059_v5 = vadd.f32 %v2057_v35, %v2049_v34 }
0x25de   :  { %2817 = vtanh.f32 %v2059_v5 }
0x25e8   :  { %v2818_v36 = vpop.eup %2817 }
0x25e9   :  { %2062 = vrot.lane.b32.xlu0 %v2818_v36, %s2977_s27 }
0x265b   :  { %v2063_v40 = vpop.permute.xlu0 %2062 }
0x265c   :  { %v2065_v44 = vmul.f32 %v2816_v31, %v2063_v40 }
0x265e   :  { %2079 = vrot.lane.b32.xlu1 %v2065_v44, %s2978_s17  ;;  %v2066_v57 = vmax.f32 %v2065_v44, 0.0 }
0x26d0   :  { %v2080_v39 = vpop.permute.xlu1 %2079 }
0x26d1   :  { %2575 = vmatmul.mubr.msk.f32.vlgmr.msra.gmra.mrb[18].mxu1 %vm99_vm1, %v2080_v39 }
0x27a4   :  { %v2149_v45 = vpop.f32.mrb[18].mxu1 }
0x27a5   :  { %v2150_v47 = vadd.f32 %v2149_v45, %v1280_v3  ;;  %v2576_v48 = vpop.f32.mrb[19].mxu1 }
0x27a7   :  { %2819 = vtanh.f32 %v2150_v47  ;;  %v2262_v50 = vmul.f32 -1.442695, %v2150_v47 }
0x27a9   :  { %2821 = vpow2.f32 %v2262_v50 }
0x27b1   :  { %v2820_v49 = vpop.eup %2819 }
0x27b2   :  { %2162 = vrot.lane.b32.xlu0 %v2820_v49, %s2977_s27 }
0x27b3   :  { %v2822_v51 = vpop.eup %2821 }
0x27b4   :  { %v2156_v52 = vadd.f32 1.0, %v2822_v51 }
0x27b6   :  { %2823 = vrcp.f32 %v2156_v52 }
0x27c0   :  { %v2824_v37 = vpop.eup %2823 }
0x27c1   :  { %v2160_v59 = vmul.f32 %v2824_v37, %v2059_v5 }
0x2824   :  { %v2163_v53 = vpop.permute.xlu0 %2162 }
0x2825   :  { %v2165_v54 = vmul.f32 %v2824_v37, %v2163_v53 }
0x2827   :  { %2167 = vrot.lane.b32.xlu1 %v2165_v54, %s2978_s17 }
0x282b   :  { %1403 = vrot.lane.b32.xlu1 %v1401_v56, %s2978_s17 }
0x282f   :  { %1624 = vrot.lane.b32.xlu1 %v1622_v10, %s2978_s17 }
0x2833   :  { %1846 = vrot.lane.b32.xlu1 %v1844_v63, %s2978_s17 }
0x2837   :  { %2068 = vrot.lane.b32.xlu1 %v2066_v57, %s2978_s17 }
0x283b   :  { %1131 = vrot.lane.b32.xlu1 %v3312_v38, %s2979_s6 }
0x2899   :  { %v2168_v60 = vpop.permute.xlu1 %2167 }
0x289a   :  { %v2170_v61 = vadd.f32 %v2168_v60, %v2160_v59 }
0x289c   :  { %2825 = vtanh.f32 %v2170_v61  ;;  %2190 = vrot.lane.b32.xlu1 %v2170_v61, %s2979_s6 }
0x289d   :  { %v1404_v30 = vpop.permute.xlu1 %1403 }
0x289e   :  { %1406 = vst.msk [vmem:[#allocation15] sm:$0xff] %vm99_vm1, %v1404_v30 }
0x28a1   :  { %v1625_v23 = vpop.permute.xlu1 %1624 }
0x28a2   :  { %1628 = vst.msk [vmem:[#allocation15 + $0x10] sm:$0xff] %vm99_vm1, %v1625_v23 }
0x28a5   :  { %v1847_v43 = vpop.permute.xlu1 %1846 }
0x28a6   :  { %v2826_v4 = vpop.eup %2825  ;;  %1850 = vst.msk [vmem:[#allocation15 + $0x20] sm:$0xff] %vm99_vm1, %v1847_v43 }
0x28a7   :  { %2173 = vrot.lane.b32.xlu0 %v2826_v4, %s2977_s27 }
0x28a9   :  { %v2069_v38 = vpop.permute.xlu1 %2068 }
0x28aa   :  { %2072 = vst.msk [vmem:[#allocation15 + $0x30] sm:$0xff] %vm99_vm1, %v2069_v38 }
0x28ab   :  { %1513 = vrot.lane.b32.xlu0 %v1511_v6, %s2978_s17 }
0x28ad   :  { %v1132_v9 = vpop.permute.xlu1 %1131 }
0x28ae   :  { %1134 = vst.msk [vmem:[#allocation5] sm:$0xff] %vm99_vm1, %v1132_v9 }
0x28af   :  { %1735 = vrot.lane.b32.xlu0 %v1733_v8, %s2978_s17 }
0x28b3   :  { %1957 = vrot.lane.b32.xlu0 %v1955_v11, %s2978_s17 }
0x290e   :  { %v2191_v13 = vpop.permute.xlu1 %2190 }
0x290f   :  { %2193 = vst.msk [vmem:[#allocation5 + $0x8] sm:$0xff] %vm99_vm1, %v2191_v13 }
0x2919   :  { %v2174_v7 = vpop.permute.xlu0 %2173 }
0x291a   :  { %v2176_v12 = vmul.f32 %v2824_v37, %v2174_v7 }
0x291c   :  { %v2177_v15 = vmax.f32 %v2176_v12, 0.0 }
0x291d   :  { %v1514_v16 = vpop.permute.xlu0 %1513 }
0x291e   :  { %1517 = vst.msk [vmem:[#allocation15 + $0x8] sm:$0xff] %vm99_vm1, %v1514_v16  ;;  %2179 = vrot.lane.b32.xlu0 %v2177_v15, %s2978_s17 }
0x2921   :  { %v1736_v46 = vpop.permute.xlu0 %1735 }
0x2922   :  { %1739 = vst.msk [vmem:[#allocation15 + $0x18] sm:$0xff] %vm99_vm1, %v1736_v46  ;;  %2185 = vrot.lane.b32.xlu0 %v2176_v12, %s2978_s17 }
0x2925   :  { %v1958_v62 = vpop.permute.xlu0 %1957 }
0x2926   :  { %1961 = vst.msk [vmem:[#allocation15 + $0x28] sm:$0xff] %vm99_vm1, %v1958_v62 }
0x2990   :  { %v2180_v55 = vpop.permute.xlu0 %2179 }
0x2991   :  { %2183 = vst.msk [vmem:[#allocation15 + $0x38] sm:$0xff] %vm99_vm1, %v2180_v55 }
0x2992   :  { %2948 = shalt.err (!%p2945_p2)
}
0x2993   :  { %s2949_s24 = scalar_lea.hbm %s3461_s7, 1024 }
0x2994   :  { %p2950_p3 = scmp.ne.s32.totalorder %s3461_s7, %s2949_s24  ;;  %p2953_p4 = scmp.lt.u32.totalorder %s2949_s24, %s3461_s7 }
0x2996   :  { %p2955_p5 = pnand %p2953_p4, %p2950_p3 }
0x2998   :  { %2958 = shalt.err (!%p2955_p5)
}
0x2999   :  { %2205 = dma.vmem_to_hbm [thread:$0]  %s2200_s20, 1024, %s3461_s7, [#allocation8], %s2969_s13, %s2969_s13, %s2970_s14   ;;  %v2186_v14 = vpop.permute.xlu0 %2185 }
0x299a   :  { %2188 = vst.msk [vmem:[#allocation4 + $0x8] sm:$0xff] %vm99_vm1, %v2186_v14 }
0x299b   :  { %2965 = dma.done.wait [#allocation8], 1024  }
0x299c   :  { %2966 = vsyncadd [#allocation8], 4294966272 }
0x299d   :  { %2209 = vsyncpa [#allocation7], 1 }
0x299e   :  { %2210 = vsyncpa [#allocation10], 1 }
0x299f   :  { %2211 = vsyncpa [#allocation13], 1 }
0x29a0   :  { %2212 = vsyncpa [#allocation8], 1 }

</bundles_post_ra>
